<compile_context>
chip_gen: v5e
topology: v5e:2x2
jax: 0.10.0
libtpu: 0.0.40
codegen_flags: <defaults>
</compile_context>

<pallas_src>
import functools

import jax
import jax.numpy as jnp
from jax import lax
from jax.experimental import pallas as pl
from jax.experimental.pallas import tpu as pltpu


# ----------------------------------------------------------------------------
# Fused kernel: all GCN layers + SimularityMatrix for one batch element.
# ----------------------------------------------------------------------------
def _net_fused_kernel(h0_ref, a_ref, w_ref, thh_ref, thx_ref, o_ref, *, n_feat):
    h0 = h0_ref[0]                                    # (Np, Fp) f32
    a_bf = a_ref[0].astype(jnp.bfloat16)              # (Np, Np) bf16, reused by all layers
    n_layers = w_ref.shape[0]

    # ---- GCN stack: x <- relu(A @ (x @ W_l)) --------------------------------
    def layer(l, x):
        w = w_ref[l].astype(jnp.bfloat16)             # (Fp, Fp)
        hw = jnp.dot(x.astype(jnp.bfloat16), w,
                     preferred_element_type=jnp.float32)
        n = jnp.dot(a_bf, hw.astype(jnp.bfloat16),
                    preferred_element_type=jnp.float32)
        return jnp.maximum(n, 0.0)                    # ReLU in f32

    x = lax.fori_loop(0, n_layers, layer, h0, unroll=True)

    # ---- SimularityMatrix ---------------------------------------------------
    # Z = [h0 | x]; padded feature columns are zero so sums over the padded
    # layout equal sums over the 2*n_feat valid features.
    d = jnp.float32(2 * n_feat)
    s = jnp.sum(h0, axis=-1, keepdims=True) + jnp.sum(x, axis=-1, keepdims=True)
    ss = (jnp.sum(h0 * h0, axis=-1, keepdims=True)
          + jnp.sum(x * x, axis=-1, keepdims=True))
    mean = s / d
    var = (ss - d * mean * mean) / (d - 1.0)          # torch unbiased (ddof=1)
    inv_std = lax.rsqrt(var)                          # EUP; no epsilon (matches torch)
    h0n = (h0 - mean) * inv_std
    xn = (x - mean) * inv_std

    th_h = thh_ref[0]                                 # (Fp,) zero in padded slots
    th_x = thx_ref[0]
    dn = (((1,), (1,)), ((), ()))                     # contract last dims -> no transpose
    sim = lax.dot_general((h0n * th_h[None, :]).astype(jnp.bfloat16),
                          h0n.astype(jnp.bfloat16),
                          dimension_numbers=dn,
                          preferred_element_type=jnp.float32)
    sim = sim + lax.dot_general((xn * th_x[None, :]).astype(jnp.bfloat16),
                                xn.astype(jnp.bfloat16),
                                dimension_numbers=dn,
                                preferred_element_type=jnp.float32)
    o_ref[0] = sim.astype(o_ref.dtype)


def _round_up(v, m):
    return (v + m - 1) // m * m


# ----------------------------------------------------------------------------
# Net wrapper: pad to lane-aligned sizes, run the fused kernel, slice back.
# ----------------------------------------------------------------------------
@jax.jit
def net_forward(h0, A, w_stack, theta):
    B, N, F = h0.shape
    L = w_stack.shape[0]
    Np = _round_up(N, 128)                            # lane-dense sim stores + full MXU tiles
    Fp = _round_up(F, 128)

    # Zero padding is inert: padded rows/cols of A, h0, W stay zero through the
    # GCN layers; padded theta entries kill padded-feature contributions to sim.
    h0_p = jnp.pad(h0, ((0, 0), (0, Np - N), (0, Fp - F)))
    A_p = jnp.pad(A, ((0, 0), (0, Np - N), (0, Np - N)))
    w_p = jnp.pad(w_stack, ((0, 0), (0, Fp - F), (0, Fp - F)))
    th_h = jnp.pad(theta[:F], (0, Fp - F)).reshape(1, Fp)
    th_x = jnp.pad(theta[F:], (0, Fp - F)).reshape(1, Fp)

    kernel = functools.partial(_net_fused_kernel, n_feat=F)
    sim_p = pl.pallas_call(
        kernel,
        out_shape=jax.ShapeDtypeStruct((B, Np, Np), h0.dtype),
        grid_spec=pltpu.PrefetchScalarGridSpec(
            num_scalar_prefetch=0,
            grid=(B,),
            in_specs=[
                pl.BlockSpec((1, Np, Fp), lambda b: (b, 0, 0)),   # h0[b]
                pl.BlockSpec((1, Np, Np), lambda b: (b, 0, 0)),   # A[b]  (read once per b)
                pl.BlockSpec((L, Fp, Fp), lambda b: (0, 0, 0)),   # all layer weights
                pl.BlockSpec((1, Fp), lambda b: (0, 0)),          # theta (h0 half)
                pl.BlockSpec((1, Fp), lambda b: (0, 0)),          # theta (x half)
            ],
            out_specs=pl.BlockSpec((1, Np, Np), lambda b: (b, 0, 0)),
        ),
        compiler_params=pltpu.CompilerParams(
            dimension_semantics=("parallel",),        # batch shards across TCs (v7x megacore)
            vmem_limit_bytes=64 * 1024 * 1024,
        ),
    )(h0_p, A_p, w_p, th_h, th_x)

    # Padded node rows normalize to NaN (zero variance) but never mix into
    # valid entries; they are dropped here.
    return sim_p[:, :N, :N]


# ----------------------------------------------------------------------------
# Parameter init matching the PyTorch reset_parameters()
# ----------------------------------------------------------------------------
def init_params(key, body_features, n_layers):
    F = body_features
    stdv_gcn = 1.0 / F / 2.0                          # GCN: 1/(2F)
    stdv_sim = 1.0 / (2 * F) / 2.0                    # SimularityMatrix: 1/(4F)
    keys = jax.random.split(key, n_layers + 1)
    w_stack = jnp.stack([
        jax.random.uniform(keys[i], (F, F), jnp.float32,
                           minval=-stdv_gcn, maxval=stdv_gcn)
        for i in range(n_layers)
    ])
    theta = jax.random.uniform(keys[-1], (2 * F,), jnp.float32,
                               minval=-stdv_sim, maxval=stdv_sim)
    return {"w_stack": w_stack, "theta": theta}


# ----------------------------------------------------------------------------
# Pure-JAX f32 reference (mirrors the PyTorch module)
# ----------------------------------------------------------------------------
def net_reference(h0, A, w_stack, theta):
    x = h0
    for l in range(w_stack.shape[0]):
        x = jax.nn.relu(jnp.einsum("bij,bjf->bif", A,
                                   jnp.einsum("bif,fg->big", x, w_stack[l])))
    z = jnp.concatenate([h0, x], axis=-1)
    mean = jnp.mean(z, axis=-1, keepdims=True)
    std = jnp.std(z, axis=-1, keepdims=True, ddof=1)
    zn = (z - mean) / std
    return jnp.einsum("bnd,d,bmd->bnm", zn, theta, zn)


if __name__ == "__main__":
    B, N, F = 2, 8, 32          # batch, nodes, body_features
    n_layers = 2

    key = jax.random.PRNGKey(0)
    k_h, k_a, k_p = jax.random.split(key, 3)

    h0 = jax.random.normal(k_h, (B, N, F), dtype=jnp.float32)
    # simple symmetric normalized-ish dense adjacency
    a_raw = jax.random.uniform(k_a, (B, N, N), dtype=jnp.float32)
    A = 0.5 * (a_raw + jnp.swapaxes(a_raw, 1, 2)) / N

    params = init_params(k_p, F, n_layers)

    sim = net_forward(h0, A, params["w_stack"], params["theta"])
    sim = jax.block_until_ready(sim)

    ref = net_reference(h0, A, params["w_stack"], params["theta"])

    assert sim.shape == (B, N, N)
    assert bool(jnp.all(jnp.isfinite(sim)))
    max_err = float(jnp.max(jnp.abs(sim - ref)))
    # bf16 MXU operands + f32 accumulation -> loose tolerance vs. f32 reference
    assert max_err < 5e-2, f"max abs error vs reference: {max_err}"
    print("KERNEL_OK")
</pallas_src>

<mosaic_0001>
module attributes {stable_mosaic.version = 11 : i64} {
  func.func @_net_fused_kernel(%arg0: i32, %arg1: memref<1x128x128xf32, #tpu.memory_space<vmem>>, %arg2: memref<1x128x128xf32, #tpu.memory_space<vmem>>, %arg3: memref<2x128x128xf32, #tpu.memory_space<vmem>>, %arg4: memref<1x128xf32, #tpu.memory_space<vmem>>, %arg5: memref<1x128xf32, #tpu.memory_space<vmem>>, %arg6: memref<1x128x128xf32, #tpu.memory_space<vmem>>) attributes {dimension_semantics = [#tpu.dimension_semantics<parallel>], iteration_bounds = array<i64: 2>, scalar_prefetch = 0 : i64, scratch_operands = 0 : i64, tpu.core_type = #tpu.core_type<tc>, window_params = [{transform_indices = @transform_0, window_bounds = array<i64: 1, 128, 128>}, {transform_indices = @transform_1, window_bounds = array<i64: 1, 128, 128>}, {pipeline_mode = #tpu.pipeline_mode<synchronous>, transform_indices = @transform_2, window_bounds = array<i64: 2, 128, 128>}, {pipeline_mode = #tpu.pipeline_mode<synchronous>, transform_indices = @transform_3, window_bounds = array<i64: 1, 128>}, {pipeline_mode = #tpu.pipeline_mode<synchronous>, transform_indices = @transform_4, window_bounds = array<i64: 1, 128>}, {transform_indices = @transform_5, window_bounds = array<i64: 1, 128, 128>}]} {
    %c0 = arith.constant 0 : index
    %c0_0 = arith.constant 0 : index
    %c0_1 = arith.constant 0 : index
    %0 = vector.load %arg1[%c0, %c0_0, %c0_1] : memref<1x128x128xf32, #tpu.memory_space<vmem>>, vector<1x128x128xf32>
    %1 = vector.shape_cast %0 : vector<1x128x128xf32> to vector<128x128xf32>
    %c0_2 = arith.constant 0 : index
    %c0_3 = arith.constant 0 : index
    %c0_4 = arith.constant 0 : index
    %2 = vector.load %arg2[%c0_2, %c0_3, %c0_4] : memref<1x128x128xf32, #tpu.memory_space<vmem>>, vector<1x128x128xf32>
    %3 = vector.shape_cast %2 : vector<1x128x128xf32> to vector<128x128xf32>
    %4 = arith.truncf %3 : vector<128x128xf32> to vector<128x128xbf16>
    %c0_i32 = arith.constant 0 : i32
    %5 = arith.index_cast %c0_i32 : i32 to index
    %c0_5 = arith.constant 0 : index
    %c0_6 = arith.constant 0 : index
    %6 = vector.load %arg3[%5, %c0_5, %c0_6] : memref<2x128x128xf32, #tpu.memory_space<vmem>>, vector<1x128x128xf32>
    %7 = vector.shape_cast %6 : vector<1x128x128xf32> to vector<128x128xf32>
    %8 = arith.truncf %7 : vector<128x128xf32> to vector<128x128xbf16>
    %9 = arith.truncf %1 : vector<128x128xf32> to vector<128x128xbf16>
    %cst = arith.constant dense<0.000000e+00> : vector<128x128xf32>
    %10 = tpu.matmul %9, %8, %cst {dimension_numbers = #tpu.dot_dimension_numbers<[1], [0], [0], [1], [0, 0, 1, 1], [], []>} : vector<128x128xbf16>, vector<128x128xbf16>, vector<128x128xf32> -> vector<128x128xf32>
    %11 = arith.truncf %10 : vector<128x128xf32> to vector<128x128xbf16>
    %cst_7 = arith.constant dense<0.000000e+00> : vector<128x128xf32>
    %12 = tpu.matmul %4, %11, %cst_7 {dimension_numbers = #tpu.dot_dimension_numbers<[1], [0], [0], [1], [0, 0, 1, 1], [], []>} : vector<128x128xbf16>, vector<128x128xbf16>, vector<128x128xf32> -> vector<128x128xf32>
    %cst_8 = arith.constant 0.000000e+00 : f32
    %13 = vector.broadcast %cst_8 : f32 to vector<128x128xf32>
    %14 = arith.maximumf %12, %13 : vector<128x128xf32>
    %c1_i32 = arith.constant 1 : i32
    %15 = arith.index_cast %c1_i32 : i32 to index
    %c0_9 = arith.constant 0 : index
    %c0_10 = arith.constant 0 : index
    %16 = vector.load %arg3[%15, %c0_9, %c0_10] : memref<2x128x128xf32, #tpu.memory_space<vmem>>, vector<1x128x128xf32>
    %17 = vector.shape_cast %16 : vector<1x128x128xf32> to vector<128x128xf32>
    %18 = arith.truncf %17 : vector<128x128xf32> to vector<128x128xbf16>
    %19 = arith.truncf %14 : vector<128x128xf32> to vector<128x128xbf16>
    %cst_11 = arith.constant dense<0.000000e+00> : vector<128x128xf32>
    %20 = tpu.matmul %19, %18, %cst_11 {dimension_numbers = #tpu.dot_dimension_numbers<[1], [0], [0], [1], [0, 0, 1, 1], [], []>} : vector<128x128xbf16>, vector<128x128xbf16>, vector<128x128xf32> -> vector<128x128xf32>
    %21 = arith.truncf %20 : vector<128x128xf32> to vector<128x128xbf16>
    %cst_12 = arith.constant dense<0.000000e+00> : vector<128x128xf32>
    %22 = tpu.matmul %4, %21, %cst_12 {dimension_numbers = #tpu.dot_dimension_numbers<[1], [0], [0], [1], [0, 0, 1, 1], [], []>} : vector<128x128xbf16>, vector<128x128xbf16>, vector<128x128xf32> -> vector<128x128xf32>
    %cst_13 = arith.constant 0.000000e+00 : f32
    %23 = vector.broadcast %cst_13 : f32 to vector<128x128xf32>
    %24 = arith.maximumf %22, %23 : vector<128x128xf32>
    %c2_i32 = arith.constant 2 : i32
    %cst_14 = arith.constant dense<0.000000e+00> : vector<128xf32>
    %25 = vector.multi_reduction <add>, %1, %cst_14 [1] : vector<128x128xf32> to vector<128xf32>
    %26 = vector.shape_cast %25 : vector<128xf32> to vector<128x1xf32>
    %cst_15 = arith.constant dense<0.000000e+00> : vector<128xf32>
    %27 = vector.multi_reduction <add>, %24, %cst_15 [1] : vector<128x128xf32> to vector<128xf32>
    %28 = vector.shape_cast %27 : vector<128xf32> to vector<128x1xf32>
    %29 = arith.addf %26, %28 : vector<128x1xf32>
    %30 = arith.mulf %1, %1 : vector<128x128xf32>
    %cst_16 = arith.constant dense<0.000000e+00> : vector<128xf32>
    %31 = vector.multi_reduction <add>, %30, %cst_16 [1] : vector<128x128xf32> to vector<128xf32>
    %32 = vector.shape_cast %31 : vector<128xf32> to vector<128x1xf32>
    %33 = arith.mulf %24, %24 : vector<128x128xf32>
    %cst_17 = arith.constant dense<0.000000e+00> : vector<128xf32>
    %34 = vector.multi_reduction <add>, %33, %cst_17 [1] : vector<128x128xf32> to vector<128xf32>
    %35 = vector.shape_cast %34 : vector<128xf32> to vector<128x1xf32>
    %36 = arith.addf %32, %35 : vector<128x1xf32>
    %cst_18 = arith.constant 6.400000e+01 : f32
    %37 = vector.broadcast %cst_18 : f32 to vector<128x1xf32>
    %38 = arith.divf %29, %37 : vector<128x1xf32>
    %cst_19 = arith.constant 6.400000e+01 : f32
    %39 = vector.broadcast %cst_19 : f32 to vector<128x1xf32>
    %40 = arith.mulf %39, %38 : vector<128x1xf32>
    %41 = arith.mulf %40, %38 : vector<128x1xf32>
    %42 = arith.subf %36, %41 : vector<128x1xf32>
    %cst_20 = arith.constant 6.400000e+01 : f32
    %cst_21 = arith.constant 1.000000e+00 : f32
    %43 = arith.subf %cst_20, %cst_21 : f32
    %44 = vector.broadcast %43 : f32 to vector<128x1xf32>
    %45 = arith.divf %42, %44 : vector<128x1xf32>
    %46 = math.rsqrt %45 : vector<128x1xf32>
    %47 = vector.broadcast %38 : vector<128x1xf32> to vector<128x128xf32>
    %48 = arith.subf %1, %47 : vector<128x128xf32>
    %49 = vector.broadcast %46 : vector<128x1xf32> to vector<128x128xf32>
    %50 = arith.mulf %48, %49 : vector<128x128xf32>
    %51 = vector.broadcast %38 : vector<128x1xf32> to vector<128x128xf32>
    %52 = arith.subf %24, %51 : vector<128x128xf32>
    %53 = vector.broadcast %46 : vector<128x1xf32> to vector<128x128xf32>
    %54 = arith.mulf %52, %53 : vector<128x128xf32>
    %c0_22 = arith.constant 0 : index
    %c0_23 = arith.constant 0 : index
    %55 = vector.load %arg4[%c0_22, %c0_23] : memref<1x128xf32, #tpu.memory_space<vmem>>, vector<1x128xf32>
    %56 = vector.shape_cast %55 : vector<1x128xf32> to vector<128xf32>
    %c0_24 = arith.constant 0 : index
    %c0_25 = arith.constant 0 : index
    %57 = vector.load %arg5[%c0_24, %c0_25] : memref<1x128xf32, #tpu.memory_space<vmem>>, vector<1x128xf32>
    %58 = vector.shape_cast %57 : vector<1x128xf32> to vector<128xf32>
    %59 = vector.shape_cast %56 : vector<128xf32> to vector<1x128xf32>
    %60 = vector.broadcast %59 : vector<1x128xf32> to vector<128x128xf32>
    %61 = arith.mulf %50, %60 : vector<128x128xf32>
    %62 = arith.truncf %61 : vector<128x128xf32> to vector<128x128xbf16>
    %63 = arith.truncf %50 : vector<128x128xf32> to vector<128x128xbf16>
    %cst_26 = arith.constant dense<0.000000e+00> : vector<128x128xf32>
    %64 = tpu.matmul %62, %63, %cst_26 {dimension_numbers = #tpu.dot_dimension_numbers<[1], [1], [0], [0], [0, 0, 1, 0], [], []>} : vector<128x128xbf16>, vector<128x128xbf16>, vector<128x128xf32> -> vector<128x128xf32>
    %65 = vector.shape_cast %58 : vector<128xf32> to vector<1x128xf32>
    %66 = vector.broadcast %65 : vector<1x128xf32> to vector<128x128xf32>
    %67 = arith.mulf %54, %66 : vector<128x128xf32>
    %68 = arith.truncf %67 : vector<128x128xf32> to vector<128x128xbf16>
    %69 = arith.truncf %54 : vector<128x128xf32> to vector<128x128xbf16>
    %cst_27 = arith.constant dense<0.000000e+00> : vector<128x128xf32>
    %70 = tpu.matmul %68, %69, %cst_27 {dimension_numbers = #tpu.dot_dimension_numbers<[1], [1], [0], [0], [0, 0, 1, 0], [], []>} : vector<128x128xbf16>, vector<128x128xbf16>, vector<128x128xf32> -> vector<128x128xf32>
    %71 = arith.addf %64, %70 : vector<128x128xf32>
    %c0_28 = arith.constant 0 : index
    %c0_29 = arith.constant 0 : index
    %c0_30 = arith.constant 0 : index
    %72 = vector.load %arg6[%c0_28, %c0_29, %c0_30] : memref<1x128x128xf32, #tpu.memory_space<vmem>>, vector<1x128x128xf32>
    %73 = vector.shape_cast %72 : vector<1x128x128xf32> to vector<128x128xf32>
    %74 = vector.shape_cast %71 : vector<128x128xf32> to vector<1x128x128xf32>
    tpu.vector_store %arg6[%c0_28, %c0_29, %c0_30], %74 {strides = array<i32>} : memref<1x128x128xf32, #tpu.memory_space<vmem>>, vector<1x128x128xf32>,
    return
  }
  func.func @transform_0(%arg0: i32) -> (i32, i32, i32) {
    %c0_i32 = arith.constant 0 : i32
    %c0_i32_0 = arith.constant 0 : i32
    %c0_i32_1 = arith.constant 0 : i32
    return %arg0, %c0_i32, %c0_i32_0 : i32, i32, i32
  }
  func.func @transform_1(%arg0: i32) -> (i32, i32, i32) {
    %c0_i32 = arith.constant 0 : i32
    %c0_i32_0 = arith.constant 0 : i32
    %c0_i32_1 = arith.constant 0 : i32
    return %arg0, %c0_i32, %c0_i32_0 : i32, i32, i32
  }
  func.func @transform_2(%arg0: i32) -> (i32, i32, i32) {
    %c0_i32 = arith.constant 0 : i32
    %c0_i32_0 = arith.constant 0 : i32
    %c0_i32_1 = arith.constant 0 : i32
    %c0_i32_2 = arith.constant 0 : i32
    return %c0_i32, %c0_i32_0, %c0_i32_1 : i32, i32, i32
  }
  func.func @transform_3(%arg0: i32) -> (i32, i32) {
    %c0_i32 = arith.constant 0 : i32
    %c0_i32_0 = arith.constant 0 : i32
    %c0_i32_1 = arith.constant 0 : i32
    return %c0_i32, %c0_i32_0 : i32, i32
  }
  func.func @transform_4(%arg0: i32) -> (i32, i32) {
    %c0_i32 = arith.constant 0 : i32
    %c0_i32_0 = arith.constant 0 : i32
    %c0_i32_1 = arith.constant 0 : i32
    return %c0_i32, %c0_i32_0 : i32, i32
  }
  func.func @transform_5(%arg0: i32) -> (i32, i32, i32) {
    %c0_i32 = arith.constant 0 : i32
    %c0_i32_0 = arith.constant 0 : i32
    %c0_i32_1 = arith.constant 0 : i32
    return %arg0, %c0_i32, %c0_i32_0 : i32, i32, i32
  }
}

</mosaic_0001>

<bundles_post_ra>
// kernel: net_forward.1
= control target key start
LH: loop header
LB: loop body
LE: loop exit
PB: predicated region body
PF: predicated region fallthrough
CT: control target
= control target key end

     0   :  { %s1507_s18 = smov 0   ;;  %s2430_s0 = inlined_call_operand.vmem [shape: f32[2,128,128], index: 0, kind: input, shape index: {}]   ;;  %s2431_s1 = inlined_call_operand.vmem [shape: f32[2,128,128], index: 1, kind: input, shape index: {}]   ;;  %s2432_s2 = inlined_call_operand.vmem [shape: f32[2,128,128], index: 2, kind: input, shape index: {}]   ;;  %s2433_s3 = inlined_call_operand.vmem [shape: f32[1,128], index: 3, kind: input, shape index: {}]   ;;  %s2434_s4 = inlined_call_operand.vmem [shape: f32[1,128], index: 4, kind: input, shape index: {}]   ;;  %s2435_s5 = inlined_call_operand.vmem [shape: f32[2,128,128], index: 5, kind: output, shape index: {}]  }
   0x1 LB: > { %s1357_s19 = sadd.s32 4294967295, %s1473_s18   ;;  %p1361_p0 = scmp.ge.s32.totalorder %s1473_s18, 1  ;;  %s1473_s18 = sphi %s1507_s18, %s15_s18  }
   0x2   : > { %p197_p1 = scmp.lt.s32.totalorder %s1473_s18, 3 }
   0x4   : > { %p198_p2 = pnand %p1361_p0, %p197_p1 }
   0x6   : > { %201 = sbr.rel (%p198_p2) target bundleno = 1407 (0x57f), region = 40 }
   0xb   : > { %v299_v0 = vld [vmem:[%s2432_s2 + $0x70] sm:$0xff]  ;;  %v300_v1 = vld [vmem:[%s2432_s2 + $0x78] sm:$0xff]  ;;  %v297_v2 = vld [vmem:[%s2432_s2 + $0x60] sm:$0xff]  ;;  %p230_p3 = scmp.lt.s32.totalorder %s1357_s19, 1 }
   0xc   : > { %v308_v3 = vpack.c.bf16 %v300_v1, %v299_v0  ;;  %v298_v4 = vld [vmem:[%s2432_s2 + $0x68] sm:$0xff]  ;;  %v295_v6 = vld [vmem:[%s2432_s2 + $0x50] sm:$0xff]  ;;  %v296_v7 = vld [vmem:[%s2432_s2 + $0x58] sm:$0xff] }
   0xd   : > { %v307_v5 = vpack.c.bf16 %v298_v4, %v297_v2  ;;  %v306_v8 = vpack.c.bf16 %v296_v7, %v295_v6  ;;  %v293_v9 = vld [vmem:[%s2432_s2 + $0x40] sm:$0xff]  ;;  %v294_v10 = vld [vmem:[%s2432_s2 + $0x48] sm:$0xff]  ;;  %v291_v12 = vld [vmem:[%s2432_s2 + $0x30] sm:$0xff]  ;;  %s2474_s19 = smov (!%p230_p3, %s1357_s19), 1 }
   0xe   : > { %1389 = vmatpush.bf16.msra.mxu2 %v308_v3  ;;  %317 = vmatpush.bf16.msra.mxu0 %v308_v3  ;;  %v305_v11 = vpack.c.bf16 %v294_v10, %v293_v9  ;;  %v292_v13 = vld [vmem:[%s2432_s2 + $0x38] sm:$0xff]  ;;  %v289_v15 = vld [vmem:[%s2432_s2 + $0x20] sm:$0xff]  ;;  %v290_v16 = vld [vmem:[%s2432_s2 + $0x28] sm:$0xff]  ;;  %s1561_s25 = sshll.u32 %s2474_s19, 7 }
   0xf   : > { %v304_v14 = vpack.c.bf16 %v292_v13, %v291_v12  ;;  %v303_v17 = vpack.c.bf16 %v290_v16, %v289_v15  ;;  %v287_v18 = vld [vmem:[%s2432_s2 + $0x10] sm:$0xff]  ;;  %v288_v19 = vld [vmem:[%s2432_s2 + $0x18] sm:$0xff]  ;;  %s1567_s28 = scalar_lea.vmem %s2430_s0, %s1561_s25  ;;  %v285_v21 = vld [vmem:[%s2432_s2] sm:$0xff]  ;;  %s1646_s9 = scalar_lea.vmem %s2431_s1, %s1561_s25 }
  0x10   : > { %v302_v20 = vpack.c.bf16 %v288_v19, %v287_v18  ;;  %v286_v22 = vld [vmem:[%s2432_s2 + $0x8] sm:$0xff]  ;;  %v1576_v23 = vld [vmem:[%s1567_s28 + $0x40] sm:$0xff]  ;;  %v1592_v30 = vld [vmem:[%s1567_s28 + $0x70] sm:$0xff]  ;;  %s2409_s29 = scalar_lea.vmem %s2435_s5, %s1561_s25 }
  0x11   : > { %v301_v24 = vpack.c.bf16 %v286_v22, %v285_v21  ;;  %v1579_v25 = vld [vmem:[%s1567_s28 + $0x48] sm:$0xff]  ;;  %v1582_v26 = vld [vmem:[%s1567_s28] sm:$0xff]  ;;  %622 = vadd.xlane.f32.xlu0 %v1592_v30  ;;  %v1596_v31 = vld [vmem:[%s1567_s28 + $0x50] sm:$0xff] }
  0x12   : > { %1390 = vmatpush.bf16.msra.mxu2 %v307_v5  ;;  %318 = vmatpush.bf16.msra.mxu0 %v307_v5  ;;  %v1585_v27 = vld [vmem:[%s1567_s28 + $0x8] sm:$0xff]  ;;  %v313_v28 = vpack.c.bf16 %v1579_v25, %v1576_v23  ;;  %v1599_v32 = vld [vmem:[%s1567_s28 + $0x78] sm:$0xff]  ;;  %v1605_v34 = vld [vmem:[%s1567_s28 + $0x10] sm:$0xff] }
  0x13   : > { %v309_v29 = vpack.c.bf16 %v1585_v27, %v1582_v26  ;;  %v1602_v33 = vld [vmem:[%s1567_s28 + $0x58] sm:$0xff]  ;;  %v1616_v38 = vld [vmem:[%s1567_s28 + $0x68] sm:$0xff]  ;;  %v1620_v39 = vld [vmem:[%s1567_s28 + $0x60] sm:$0xff]  ;;  %v316_v46 = vpack.c.bf16 %v1599_v32, %v1592_v30 }
  0x14   : > { %v1608_v35 = vld [vmem:[%s1567_s28 + $0x18] sm:$0xff]  ;;  %v314_v36 = vpack.c.bf16 %v1602_v33, %v1596_v31  ;;  %v1623_v40 = vld [vmem:[%s1567_s28 + $0x20] sm:$0xff]  ;;  %v1626_v41 = vld [vmem:[%s1567_s28 + $0x28] sm:$0xff]  ;;  %v315_v42 = vpack.c.bf16 %v1616_v38, %v1620_v39 }
  0x15   : > { %v310_v37 = vpack.c.bf16 %v1608_v35, %v1605_v34  ;;  %v311_v43 = vpack.c.bf16 %v1626_v41, %v1623_v40  ;;  %v1633_v44 = vld [vmem:[%s1567_s28 + $0x30] sm:$0xff]  ;;  %v1636_v45 = vld [vmem:[%s1567_s28 + $0x38] sm:$0xff]  ;;  %v261_v7 = vld [vmem:[%s1646_s9] sm:$0xff] }
  0x16   : > { %1391 = vmatpush.bf16.msra.mxu2 %v306_v8  ;;  %319 = vmatpush.bf16.msra.mxu0 %v306_v8  ;;  %v312_v47 = vpack.c.bf16 %v1636_v45, %v1633_v44  ;;  %v262_v8 = vld [vmem:[%s1646_s9 + $0x8] sm:$0xff]  ;;  %v264_v12 = vld [vmem:[%s1646_s9 + $0x18] sm:$0xff]  ;;  %v271_v19 = vld [vmem:[%s1646_s9 + $0x50] sm:$0xff] }
  0x17   : > { %v1650_v10 = vpack.c.bf16 %v262_v8, %v261_v7  ;;  %v270_v15 = vld [vmem:[%s1646_s9 + $0x48] sm:$0xff] }
  0x18   : > { %v266_v18 = vld [vmem:[%s1646_s9 + $0x28] sm:$0xff] }
  0x19   : > { %624 = vadd.xlane.f32.xlu0 %v1599_v32 }
  0x1a   : > { %1392 = vmatpush.bf16.msra.mxu2 %v305_v11  ;;  %320 = vmatpush.bf16.msra.mxu0 %v305_v11  ;;  %v263_v11 = vld [vmem:[%s1646_s9 + $0x10] sm:$0xff] }
  0x1b   : > { %v1655_v13 = vpack.c.bf16 %v264_v12, %v263_v11 }
  0x1e   : > { %1393 = vmatpush.bf16.msra.mxu2 %v304_v14  ;;  %321 = vmatpush.bf16.msra.mxu0 %v304_v14  ;;  %v269_v14 = vld [vmem:[%s1646_s9 + $0x40] sm:$0xff] }
  0x1f   : > { %v1660_v16 = vpack.c.bf16 %v270_v15, %v269_v14 }
  0x21   : > { %620 = vadd.xlane.f32.xlu0 %v1616_v38 }
  0x22   : > { %1394 = vmatpush.bf16.msra.mxu2 %v303_v17  ;;  %322 = vmatpush.bf16.msra.mxu0 %v303_v17  ;;  %v265_v17 = vld [vmem:[%s1646_s9 + $0x20] sm:$0xff] }
  0x23   : > { %v1667_v21 = vpack.c.bf16 %v266_v18, %v265_v17 }
  0x26   : > { %1395 = vmatpush.bf16.msra.mxu2 %v302_v20  ;;  %323 = vmatpush.bf16.msra.mxu0 %v302_v20  ;;  %v272_v20 = vld [vmem:[%s1646_s9 + $0x58] sm:$0xff] }
  0x27   : > { %v1669_v22 = vpack.c.bf16 %v272_v20, %v271_v19 }
  0x2a   : > { %1396 = vmatpush.bf16.msra.mxu2 %v301_v24  ;;  %324 = vmatpush.bf16.msra.mxu0 %v301_v24  ;;  %v1382_v24 = vld [vmem:[%s2432_s2 + $0xf0] sm:$0xff] }
  0x2d   : > { %345 = vmatmul.bf16.vlgmr.msra.gmra.mxu2 %v313_v28  ;;  %325 = vmatmul.bf16.vlgmr.msra.gmra.mxu0 %v309_v29  ;;  %v1383_v28 = vld [vmem:[%s2432_s2 + $0xf8] sm:$0xff]  ;;  %v1380_v29 = vld [vmem:[%s2432_s2 + $0xe0] sm:$0xff] }
  0x3d   : > { %350 = vmatmul.bf16.gmra.mxu2 %v314_v36  ;;  %330 = vmatmul.bf16.gmra.mxu0 %v310_v37  ;;  %v463_v36 = vpack.c.bf16 %v1383_v28, %v1382_v24  ;;  %v1381_v37 = vld [vmem:[%s2432_s2 + $0xe8] sm:$0xff] }
  0x3f   : > { %472 = vmatpush.bf16.msrb.mxu2 %v463_v36 }
  0x4d   : > { %355 = vmatmul.bf16.gmra.mxu2 %v315_v42  ;;  %335 = vmatmul.bf16.gmra.mxu0 %v311_v43  ;;  %v462_v42 = vpack.c.bf16 %v1381_v37, %v1380_v29  ;;  %v1378_v43 = vld [vmem:[%s2432_s2 + $0xd0] sm:$0xff] }
  0x4f   : > { %473 = vmatpush.bf16.msrb.mxu2 %v462_v42 }
  0x5d   : > { %360 = vmatmul.bf16.gmra.mxu2 %v316_v46  ;;  %340 = vmatmul.bf16.gmra.mxu0 %v312_v47  ;;  %v1379_v46 = vld [vmem:[%s2432_s2 + $0xd8] sm:$0xff]  ;;  %v267_v47 = vld [vmem:[%s1646_s9 + $0x30] sm:$0xff] }
  0xaa   : > { %v326_v49 = vpop.f32.mrf.mxu0 }
  0xb0   : > { %v346_v48 = vpop.f32.mrf.mxu2 }
  0xb2   : > { %v328_v51 = vpop.f32.mrf.mxu0 }
  0xb3   : > { %v366_v9 = vpack.c.bf16 %v328_v51, %v326_v49  ;;  %v461_v49 = vpack.c.bf16 %v1379_v46, %v1378_v43  ;;  %v1377_v51 = vld [vmem:[%s2432_s2 + $0xc8] sm:$0xff] }
  0xb5   : > { %474 = vmatpush.bf16.msrb.mxu2 %v461_v49 }
  0xb8   : > { %v348_v50 = vpop.f32.mrf.mxu2 }
  0xb9   : > { %v370_v2 = vpack.c.bf16 %v348_v50, %v346_v48  ;;  %v268_v48 = vld [vmem:[%s1646_s9 + $0x38] sm:$0xff]  ;;  %v1376_v50 = vld [vmem:[%s2432_s2 + $0xc0] sm:$0xff] }
  0xba   : > { %v331_v53 = vpop.f32.mrf.mxu0 }
  0xc0   : > { %v351_v52 = vpop.f32.mrf.mxu2 }
  0xc2   : > { %v333_v55 = vpop.f32.mrf.mxu0 }
  0xc3   : > { %v367_v6 = vpack.c.bf16 %v333_v55, %v331_v53  ;;  %v274_v53 = vld [vmem:[%s1646_s9 + $0x68] sm:$0xff]  ;;  %v460_v55 = vpack.c.bf16 %v1377_v51, %v1376_v50 }
  0xc5   : > { %475 = vmatpush.bf16.msrb.mxu2 %v460_v55 }
  0xc8   : > { %v353_v54 = vpop.f32.mrf.mxu2 }
  0xc9   : > { %v371_v1 = vpack.c.bf16 %v353_v54, %v351_v52  ;;  %v273_v52 = vld [vmem:[%s1646_s9 + $0x60] sm:$0xff]  ;;  %v1701_v54 = vpack.c.bf16 %v268_v48, %v267_v47 }
  0xca   : > { %v336_v57 = vpop.f32.mrf.mxu0 }
  0xd0   : > { %v356_v56 = vpop.f32.mrf.mxu2 }
  0xd2   : > { %v338_v60 = vpop.f32.mrf.mxu0 }
  0xd3   : > { %v368_v5 = vpack.c.bf16 %v338_v60, %v336_v57  ;;  %v1374_v57 = vld [vmem:[%s2432_s2 + $0xb0] sm:$0xff] }
  0xd4   : > { %v275_v60 = vld [vmem:[%s1646_s9 + $0x70] sm:$0xff] }
  0xd8   : > { %v358_v58 = vpop.f32.mrf.mxu2 }
  0xd9   : > { %v372_v0 = vpack.c.bf16 %v358_v58, %v356_v56  ;;  %v1703_v56 = vpack.c.bf16 %v274_v53, %v273_v52  ;;  %v1375_v58 = vld [vmem:[%s2432_s2 + $0xb8] sm:$0xff] }
  0xda   : > { %v341_v63 = vpop.f32.mrf.mxu0 }
  0xe0   : > { %v361_v59 = vpop.f32.mrf.mxu2 }
  0xe2   : > { %v343_v3 = vpop.f32.mrf.mxu0 }
  0xe3   : > { %v369_v4 = vpack.c.bf16 %v343_v3, %v341_v63  ;;  %v1372_v63 = vld [vmem:[%s2432_s2 + $0xa0] sm:$0xff]  ;;  %v1371_v3 = vld [vmem:[%s2432_s2 + $0x98] sm:$0xff] }
  0xe8   : > { %v363_v61 = vpop.f32.mrf.mxu2 }
  0xe9   : > { %v373_v62 = vpack.c.bf16 %v363_v61, %v361_v59  ;;  %v459_v59 = vpack.c.bf16 %v1375_v58, %v1374_v57  ;;  %v276_v61 = vld [vmem:[%s1646_s9 + $0x78] sm:$0xff] }
  0xeb   : > { %374 = vmatpush.bf16.msra.mxu1 %v373_v62  ;;  %1397 = vmatpush.bf16.msra.mxu3 %v373_v62  ;;  %v1715_v62 = vpack.c.bf16 %v276_v61, %v275_v60 }
  0xec   : > { %476 = vmatpush.bf16.msrb.mxu2 %v459_v59 }
  0xef   : > { %375 = vmatpush.bf16.msra.mxu1 %v372_v0  ;;  %1398 = vmatpush.bf16.msra.mxu3 %v372_v0  ;;  %v1373_v0 = vld [vmem:[%s2432_s2 + $0xa8] sm:$0xff] }
  0xf3   : > { %376 = vmatpush.bf16.msra.mxu1 %v371_v1  ;;  %1399 = vmatpush.bf16.msra.mxu3 %v371_v1  ;;  %v458_v1 = vpack.c.bf16 %v1373_v0, %v1372_v63 }
  0xf5   : > { %477 = vmatpush.bf16.msrb.mxu2 %v458_v1 }
  0xf7   : > { %377 = vmatpush.bf16.msra.mxu1 %v370_v2  ;;  %1400 = vmatpush.bf16.msra.mxu3 %v370_v2  ;;  %v1370_v2 = vld [vmem:[%s2432_s2 + $0x90] sm:$0xff] }
  0xfb   : > { %378 = vmatpush.bf16.msra.mxu1 %v369_v4  ;;  %1401 = vmatpush.bf16.msra.mxu3 %v369_v4  ;;  %v457_v4 = vpack.c.bf16 %v1371_v3, %v1370_v2 }
  0xfd   : > { %478 = vmatpush.bf16.msrb.mxu2 %v457_v4 }
  0xff   : > { %379 = vmatpush.bf16.msra.mxu1 %v368_v5  ;;  %1402 = vmatpush.bf16.msra.mxu3 %v368_v5  ;;  %v1368_v5 = vld [vmem:[%s2432_s2 + $0x80] sm:$0xff] }
 0x103   : > { %380 = vmatpush.bf16.msra.mxu1 %v367_v6  ;;  %1403 = vmatpush.bf16.msra.mxu3 %v367_v6  ;;  %v1369_v6 = vld [vmem:[%s2432_s2 + $0x88] sm:$0xff] }
 0x104   : > { %v456_v7 = vpack.c.bf16 %v1369_v6, %v1368_v5 }
 0x106   : > { %479 = vmatpush.bf16.msrb.mxu2 %v456_v7 }
 0x107   : > { %381 = vmatpush.bf16.msra.mxu1 %v366_v9  ;;  %1404 = vmatpush.bf16.msra.mxu3 %v366_v9 }
 0x10a   : > { %382 = vmatmul.bf16.vlgmr.msra.gmra.mxu1 %v1650_v10  ;;  %402 = vmatmul.bf16.vlgmr.msra.gmra.mxu3 %v1660_v16 }
 0x11a   : > { %387 = vmatmul.bf16.gmra.mxu1 %v1655_v13  ;;  %407 = vmatmul.bf16.gmra.mxu3 %v1669_v22 }
 0x12a   : > { %392 = vmatmul.bf16.gmra.mxu1 %v1667_v21  ;;  %412 = vmatmul.bf16.gmra.mxu3 %v1703_v56 }
 0x13a   : > { %397 = vmatmul.bf16.gmra.mxu1 %v1701_v54  ;;  %417 = vmatmul.bf16.gmra.mxu3 %v1715_v62 }
 0x187   : > { %v383_v8 = vpop.f32.mrf.mxu1 }
 0x188   : > { %v423_v11 = vmax.f32 %v383_v8, 0.0 }
 0x18d   : > { %v403_v42 = vpop.f32.mrf.mxu3 }
 0x18e   : > { %v431_v52 = vmax.f32 %v403_v42, 0.0 }
 0x18f   : > { %v385_v9 = vpop.f32.mrf.mxu1 }
 0x190   : > { %v424_v12 = vmax.f32 %v385_v9, 0.0 }
 0x192   : > { %v464_v14 = vpack.c.bf16 %v424_v12, %v423_v11 }
 0x194   : > { %480 = vmatmul.bf16.vlgmr.msrb.gmra.mxu2 %v464_v14 }
 0x195   : > { %v405_v47 = vpop.f32.mrf.mxu3 }
 0x196   : > { %v432_v53 = vmax.f32 %v405_v47, 0.0 }
 0x197   : > { %v388_v15 = vpop.f32.mrf.mxu1 }
 0x198   : > { %v425_v18 = vmax.f32 %v388_v15, 0.0  ;;  %v468_v55 = vpack.c.bf16 %v432_v53, %v431_v52  ;;  %v688_v53 = vmul.f32 %v1592_v30, %v1592_v30  ;;  %v685_v30 = vmul.f32 %v1602_v33, %v1602_v33 }
 0x19a   : > { %718 = vadd.xlane.f32.xlu2 %v688_v53 }
 0x19d   : > { %v408_v51 = vpop.f32.mrf.mxu3 }
 0x19e   : > { %v433_v59 = vmax.f32 %v408_v51, 0.0 }
 0x19f   : > { %v390_v17 = vpop.f32.mrf.mxu1 }
 0x1a0   : > { %v426_v19 = vmax.f32 %v390_v17, 0.0 }
 0x1a2   : > { %v465_v20 = vpack.c.bf16 %v426_v19, %v425_v18 }
 0x1a4   : > { %485 = vmatmul.bf16.gmra.mxu2 %v465_v20 }
 0x1a5   : > { %v410_v57 = vpop.f32.mrf.mxu3 }
 0x1a6   : > { %v434_v60 = vmax.f32 %v410_v57, 0.0  ;;  %v686_v57 = vmul.f32 %v1620_v39, %v1620_v39 }
 0x1a7   : > { %v393_v24 = vpop.f32.mrf.mxu1 }
 0x1a8   : > { %v427_v29 = vmax.f32 %v393_v24, 0.0  ;;  %v469_v61 = vpack.c.bf16 %v434_v60, %v433_v59  ;;  %714 = vadd.xlane.f32.xlu0 %v686_v57 }
 0x1ad   : > { %v413_v58 = vpop.f32.mrf.mxu3 }
 0x1ae   : > { %v435_v0 = vmax.f32 %v413_v58, 0.0 }
 0x1af   : > { %v395_v28 = vpop.f32.mrf.mxu1 }
 0x1b0   : > { %v428_v36 = vmax.f32 %v395_v28, 0.0  ;;  %712 = vadd.xlane.f32.xlu0 %v685_v30 }
 0x1b2   : > { %v466_v37 = vpack.c.bf16 %v428_v36, %v427_v29 }
 0x1b4   : > { %490 = vmatmul.bf16.gmra.mxu2 %v466_v37 }
 0x1b5   : > { %v415_v63 = vpop.f32.mrf.mxu3 }
 0x1b6   : > { %v436_v1 = vmax.f32 %v415_v63, 0.0 }
 0x1b7   : > { %v398_v43 = vpop.f32.mrf.mxu1 }
 0x1b8   : > { %v429_v48 = vmax.f32 %v398_v43, 0.0  ;;  %v470_v3 = vpack.c.bf16 %v436_v1, %v435_v0  ;;  %610 = vadd.xlane.f32.xlu0 %v1576_v23 }
 0x1bd   : > { %v418_v2 = vpop.f32.mrf.mxu3 }
 0x1be   : > { %v437_v5 = vmax.f32 %v418_v2, 0.0  ;;  %v1799_v2 = vpop.xlane.xlu0 %622 }
 0x1bf   : > { %v400_v46 = vpop.f32.mrf.mxu1 }
 0x1c0   : > { %v430_v49 = vmax.f32 %v400_v46, 0.0  ;;  %608 = vadd.xlane.f32.xlu0 %v1636_v45 }
 0x1c2   : > { %v467_v50 = vpack.c.bf16 %v430_v49, %v429_v48 }
 0x1c4   : > { %495 = vmatmul.bf16.gmra.mxu2 %v467_v50 }
 0x1c5   : > { %v420_v4 = vpop.f32.mrf.mxu3 }
 0x1c6   : > { %v438_v6 = vmax.f32 %v420_v4, 0.0 }
 0x1c8   : > { %v471_v7 = vpack.c.bf16 %v438_v6, %v437_v5 }
 0x1d4   : > { %500 = vmatmul.bf16.gmra.mxu2 %v468_v55  ;;  %v687_v55 = vmul.f32 %v1616_v38, %v1616_v38  ;;  %v684_v38 = vmul.f32 %v1596_v31, %v1596_v31 }
 0x1d6   : > { %716 = vadd.xlane.f32.xlu1 %v687_v55 }
 0x1de   : > { %614 = vadd.xlane.f32.xlu1 %v1596_v31 }
 0x1e4   : > { %505 = vmatmul.bf16.gmra.mxu2 %v469_v61 }
 0x1e6   : > { %612 = vadd.xlane.f32.xlu1 %v1579_v25 }
 0x1f4   : > { %510 = vmatmul.bf16.gmra.mxu2 %v470_v3 }
 0x204   : > { %515 = vmatmul.bf16.gmra.mxu2 %v471_v7  ;;  %v1806_v7 = vpop.xlane.xlu0 %624 }
 0x217   : > { %v481_v8 = vpop.f32.mrf.mxu2 }
 0x21f   : > { %v483_v9 = vpop.f32.mrf.mxu2 }
 0x220   : > { %v521_v11 = vpack.c.bf16 %v483_v9, %v481_v8 }
 0x227   : > { %v486_v12 = vpop.f32.mrf.mxu2 }
 0x22f   : > { %v488_v14 = vpop.f32.mrf.mxu2 }
 0x230   : > { %v522_v15 = vpack.c.bf16 %v488_v14, %v486_v12  ;;  %v1813_v12 = vpop.xlane.xlu2 %718 }
 0x237   : > { %v491_v17 = vpop.f32.mrf.mxu2 }
 0x23f   : > { %v493_v18 = vpop.f32.mrf.mxu2 }
 0x240   : > { %v523_v19 = vpack.c.bf16 %v493_v18, %v491_v17 }
 0x247   : > { %v496_v20 = vpop.f32.mrf.mxu2 }
 0x24f   : > { %v498_v24 = vpop.f32.mrf.mxu2 }
 0x250   : > { %v524_v28 = vpack.c.bf16 %v498_v24, %v496_v20  ;;  %v1824_v20 = vpop.xlane.xlu1 %716 }
 0x257   : > { %v501_v29 = vpop.f32.mrf.mxu2 }
 0x25f   : > { %v503_v36 = vpop.f32.mrf.mxu2 }
 0x260   : > { %v525_v52 = vpack.c.bf16 %v503_v36, %v501_v29 }
 0x267   : > { %v506_v37 = vpop.f32.mrf.mxu2 }
 0x26f   : > { %v508_v42 = vpop.f32.mrf.mxu2 }
 0x270   : > { %v526_v51 = vpack.c.bf16 %v508_v42, %v506_v37 }
 0x277   : > { %v511_v43 = vpop.f32.mrf.mxu2 }
 0x27f   : > { %v513_v46 = vpop.f32.mrf.mxu2 }
 0x280   : > { %v527_v50 = vpack.c.bf16 %v513_v46, %v511_v43  ;;  %v1837_v43 = vpop.xlane.xlu1 %614 }
 0x287   : > { %v516_v47 = vpop.f32.mrf.mxu2 }
 0x28f   : > { %v518_v48 = vpop.f32.mrf.mxu2 }
 0x290   : > { %v528_v49 = vpack.c.bf16 %v518_v48, %v516_v47 }
 0x292   : > { %529 = vmatpush.bf16.msrb.mxu3 %v528_v49 }
 0x296   : > { %530 = vmatpush.bf16.msrb.mxu3 %v527_v50  ;;  %v678_v50 = vmul.f32 %v1623_v40, %v1623_v40 }
 0x29a   : > { %531 = vmatpush.bf16.msrb.mxu3 %v526_v51 }
 0x29e   : > { %532 = vmatpush.bf16.msrb.mxu3 %v525_v52  ;;  %v1851_v52 = vpop.xlane.xlu1 %612 }
 0x2a2   : > { %533 = vmatpush.bf16.msrb.mxu3 %v524_v28 }
 0x2a6   : > { %534 = vmatpush.bf16.msrb.mxu3 %v523_v19 }
 0x2aa   : > { %535 = vmatpush.bf16.msrb.mxu3 %v522_v15  ;;  %v1817_v15 = vpop.xlane.xlu0 %620 }
 0x2ae   : > { %536 = vmatpush.bf16.msrb.mxu3 %v521_v11 }
 0x2b1   : > { %537 = vmatmul.bf16.vlgmr.msrb.gmra.mxu3 %v1650_v10  ;;  %v689_v10 = vmul.f32 %v1599_v32, %v1599_v32  ;;  %v682_v32 = vmul.f32 %v1576_v23, %v1576_v23 }
 0x2b2   : > { %v1830_v29 = vpop.xlane.xlu0 %714 }
 0x2b3   : > { %720 = vadd.xlane.f32.xlu2 %v689_v10  ;;  %706 = vadd.xlane.f32.xlu1 %v682_v32 }
 0x2ba   : > { %v1842_v47 = vpop.xlane.xlu0 %712 }
 0x2bb   : > { %618 = vadd.xlane.f32.xlu2 %v1620_v39  ;;  %v681_v39 = vmul.f32 %v1636_v45, %v1636_v45 }
 0x2bd   : > { %704 = vadd.xlane.f32.xlu1 %v681_v39 }
 0x2c1   : > { %542 = vmatmul.bf16.gmra.mxu3 %v1655_v13  ;;  %v683_v13 = vmul.f32 %v1579_v25, %v1579_v25 }
 0x2c2   : > { %v1857_v10 = vpop.xlane.xlu0 %610 }
 0x2c3   : > { %616 = vadd.xlane.f32.xlu2 %v1602_v33  ;;  %v680_v33 = vmul.f32 %v1633_v44, %v1633_v44 }
 0x2c5   : > { %702 = vadd.xlane.f32.xlu0 %v680_v33  ;;  %602 = vadd.xlane.f32.xlu1 %v1623_v40  ;;  %v679_v40 = vmul.f32 %v1626_v41, %v1626_v41 }
 0x2cb   : > { %710 = vadd.xlane.f32.xlu2 %v684_v38 }
 0x2d1   : > { %547 = vmatmul.bf16.gmra.mxu3 %v1667_v21 }
 0x2d3   : > { %708 = vadd.xlane.f32.xlu2 %v683_v13  ;;  %v1872_v13 = vpop.xlane.xlu0 %608 }
 0x2db   : > { %606 = vadd.xlane.f32.xlu2 %v1633_v44 }
 0x2e1   : > { %552 = vmatmul.bf16.gmra.mxu3 %v1701_v54 }
 0x2e3   : > { %604 = vadd.xlane.f32.xlu2 %v1626_v41  ;;  %v677_v41 = vmul.f32 %v1608_v35, %v1608_v35 }
 0x2f1   : > { %557 = vmatmul.bf16.gmra.mxu3 %v1660_v16 }
 0x301   : > { %562 = vmatmul.bf16.gmra.mxu3 %v1669_v22 }
 0x311   : > { %567 = vmatmul.bf16.gmra.mxu3 %v1703_v56 }
 0x321   : > { %572 = vmatmul.bf16.gmra.mxu3 %v1715_v62 }
 0x326   : > { %v1826_v24 = vpop.xlane.xlu2 %720  ;;  %v1866_v38 = vpop.xlane.xlu1 %706 }
 0x32e   : > { %v1839_v46 = vpop.xlane.xlu2 %618 }
 0x334   : > { %v1770_v23 = vpop.f32.mrf.mxu3 }
 0x336   : > { %v1853_v53 = vpop.xlane.xlu2 %616 }
 0x33c   : > { %v1774_v31 = vpop.f32.mrf.mxu3 }
 0x33e   : > { %v1868_v39 = vpop.xlane.xlu2 %710 }
 0x344   : > { %v1777_v16 = vpop.f32.mrf.mxu3 }
 0x34c   : > { %v1779_v21 = vpop.f32.mrf.mxu3 }
 0x354   : > { %v548_v22 = vpop.f32.mrf.mxu3 }
 0x355   : > { %v1781_v54 = vmax.f32 %v548_v22, 0.0  ;;  %v1875_v22 = vmax.f32 %v1777_v16, 0.0  ;;  %v1475_v16 = vmov 64.0  }
 0x356   : > { %1417 = vrcp.f32 %v1475_v16 }
 0x357   : > { %634 = vadd.xlane.f32.xlu0 %v1781_v54 }
 0x35c   : > { %v550_v25 = vpop.f32.mrf.mxu3 }
 0x35d   : > { %v1855_v55 = vmax.f32 %v550_v25, 0.0  ;;  %v705_v25 = vpop.xlane.xlu1 %704 }
 0x35f   : > { %v727_v32 = vmul.f32 %v1855_v55, %v1855_v55 }
 0x364   : > { %v553_v56 = vpop.f32.mrf.mxu3 }
 0x365   : > { %v1784_v62 = vmax.f32 %v553_v56, 0.0  ;;  %v1881_v56 = vpop.xlane.xlu2 %708 }
 0x367   : > { %638 = vadd.xlane.f32.xlu1 %v1784_v62  ;;  %v728_v58 = vmul.f32 %v1784_v62, %v1784_v62 }
 0x369   : > { %750 = vadd.xlane.f32.xlu2 %v728_v58  ;;  %v1884_v58 = vmax.f32 %v1779_v21, 0.0  ;;  %v1476_v21 = vmov 63.0  }
 0x36a   : > { %1419 = vrcp.f32 %v1476_v21 }
 0x36c   : > { %v555_v59 = vpop.f32.mrf.mxu3 }
 0x36d   : > { %v1789_v60 = vmax.f32 %v555_v59, 0.0  ;;  %v703_v59 = vpop.xlane.xlu0 %702 }
 0x36f   : > { %v729_v61 = vmul.f32 %v1789_v60, %v1789_v60 }
 0x371   : > { %640 = vadd.xlane.f32.xlu2 %v1789_v60  ;;  %752 = vadd.xlane.f32.xlu0 %v729_v61  ;;  %v726_v61 = vmul.f32 %v1781_v54, %v1781_v54 }
 0x374   : > { %v558_v63 = vpop.f32.mrf.mxu3 }
 0x375   : > { %v1794_v0 = vmax.f32 %v558_v63, 0.0  ;;  %v724_v63 = vmul.f32 %v1875_v22, %v1875_v22 }
 0x377   : > { %v730_v1 = vmul.f32 %v1794_v0, %v1794_v0 }
 0x379   : > { %642 = vadd.xlane.f32.xlu2 %v1794_v0  ;;  %754 = vadd.xlane.f32.xlu0 %v730_v1  ;;  %v603_v1 = vpop.xlane.xlu1 %602 }
 0x37c   : > { %v560_v3 = vpop.f32.mrf.mxu3 }
 0x37d   : > { %v1801_v4 = vmax.f32 %v560_v3, 0.0  ;;  %v607_v3 = vpop.xlane.xlu2 %606 }
 0x37f   : > { %v731_v5 = vmul.f32 %v1801_v4, %v1801_v4 }
 0x381   : > { %644 = vadd.xlane.f32.xlu0 %v1801_v4  ;;  %756 = vadd.xlane.f32.xlu1 %v731_v5  ;;  %v1418_v5 = vpop.eup %1417 }
 0x382   : > { %vm791_vm0 = vweird.f32 %v1418_v5 }
 0x384   : > { %v563_v6 = vpop.f32.mrf.mxu3 }
 0x385   : > { %v1808_v8 = vmax.f32 %v563_v6, 0.0 }
 0x387   : > { %v732_v9 = vmul.f32 %v1808_v8, %v1808_v8 }
 0x389   : > { %646 = vadd.xlane.f32.xlu0 %v1808_v8  ;;  %758 = vadd.xlane.f32.xlu1 %v732_v9 }
 0x38c   : > { %v565_v11 = vpop.f32.mrf.mxu3 }
 0x38d   : > { %v1815_v14 = vmax.f32 %v565_v11, 0.0  ;;  %v787_v11 = vmul.f32 64.0, %v1418_v5 }
 0x38f   : > { %v733_v17 = vmul.f32 %v1815_v14, %v1815_v14 }
 0x391   : > { %648 = vadd.xlane.f32.xlu1 %v1815_v14  ;;  %760 = vadd.xlane.f32.xlu2 %v733_v17  ;;  %v1420_v17 = vpop.eup %1419 }
 0x392   : > { %vm862_vm1 = vweird.f32 %v1420_v17 }
 0x394   : > { %v568_v18 = vpop.f32.mrf.mxu3 }
 0x395   : > { %v1822_v19 = vmax.f32 %v568_v18, 0.0  ;;  %v1896_v18 = vmax.f32 %v1774_v31, 0.0  ;;  %v674_v31 = vmul.f32 %v1582_v26, %v1582_v26 }
 0x397   : > { %v734_v28 = vmul.f32 %v1822_v19, %v1822_v19  ;;  %v723_v21 = vmul.f32 %v1896_v18, %v1896_v18 }
 0x399   : > { %650 = vadd.xlane.f32.xlu1 %v1822_v19  ;;  %762 = vadd.xlane.f32.xlu2 %v734_v28  ;;  %v788_v28 = vsub.f32 1.0, %v787_v11 }
 0x39c   : > { %v570_v36 = vpop.f32.mrf.mxu3 }
 0x39d   : > { %v1833_v37 = vmax.f32 %v570_v36, 0.0  ;;  %v1901_v36 = vpop.xlane.xlu2 %604 }
 0x39f   : > { %v735_v42 = vmul.f32 %v1833_v37, %v1833_v37 }
 0x3a1   : > { %652 = vadd.xlane.f32.xlu2 %v1833_v37  ;;  %764 = vadd.xlane.f32.xlu0 %v735_v42  ;;  %v858_v42 = vmul.f32 63.0, %v1420_v17 }
 0x3a4   : > { %v573_v48 = vpop.f32.mrf.mxu3 }
 0x3a5   : > { %v1844_v49 = vmax.f32 %v573_v48, 0.0  ;;  %v1904_v48 = vmax.f32 %v1770_v23, 0.0 }
 0x3a7   : > { %654 = vadd.xlane.f32.xlu1 %v1844_v49  ;;  %v736_v51 = vmul.f32 %v1844_v49, %v1844_v49 }
 0x3a9   : > { %698 = vadd.xlane.f32.xlu2 %v678_v50  ;;  %766 = vadd.xlane.f32.xlu0 %v736_v51  ;;  %v676_v50 = vmul.f32 %v1605_v34, %v1605_v34  ;;  %v789_v51 = vmul.f32 %v1418_v5, %v788_v28 }
 0x3ac   : > { %v575_v57 = vpop.f32.mrf.mxu3 }
 0x3ad   : > { %v1859_v30 = vmax.f32 %v575_v57, 0.0  ;;  %v859_v57 = vsub.f32 1.0, %v858_v42 }
 0x3af   : > { %656 = vadd.xlane.f32.xlu1 %v1859_v30  ;;  %v737_v33 = vmul.f32 %v1859_v30, %v1859_v30 }
 0x3b1   : > { %748 = vadd.xlane.f32.xlu2 %v727_v32  ;;  %700 = vadd.xlane.f32.xlu0 %v679_v40  ;;  %v790_v40 = vadd.f32 %v1418_v5, %v789_v51 }
 0x3b7   : > { %768 = vadd.xlane.f32.xlu1 %v737_v33  ;;  %v860_v33 = vmul.f32 %v1420_v17, %v859_v57 }
 0x3b9   : > { %630 = vadd.xlane.f32.xlu2 %v1875_v22  ;;  %598 = vadd.xlane.f32.xlu0 %v1605_v34 }
 0x3bf   : > { %636 = vadd.xlane.f32.xlu1 %v1855_v55 }
 0x3c1   : > { %696 = vadd.xlane.f32.xlu2 %v677_v41  ;;  %632 = vadd.xlane.f32.xlu0 %v1884_v58  ;;  %v1912_v41 = vsel %vm791_vm0, %v1418_v5, %v790_v40 }
 0x3c7   : > { %746 = vadd.xlane.f32.xlu1 %v726_v61 }
 0x3c9   : > { %594 = vadd.xlane.f32.xlu2 %v1582_v26  ;;  %742 = vadd.xlane.f32.xlu0 %v724_v63  ;;  %v725_v26 = vmul.f32 %v1884_v58, %v1884_v58  ;;  %v861_v63 = vadd.f32 %v1420_v17, %v860_v33 }
 0x3ca   : > { %v635_v6 = vpop.xlane.xlu0 %634 }
 0x3cb   : > { %v1893_v9 = vadd.f32 %v635_v6, %v603_v1  ;;  %v1919_v11 = vsel %vm862_vm1, %v1420_v17, %v861_v63  ;;  %v675_v17 = vmul.f32 %v1585_v27, %v1585_v27 }
 0x3cf   : > { %600 = vadd.xlane.f32.xlu1 %v1608_v35  ;;  %v722_v35 = vmul.f32 %v1904_v48, %v1904_v48 }
 0x3d1   : > { %628 = vadd.xlane.f32.xlu2 %v1896_v18  ;;  %596 = vadd.xlane.f32.xlu0 %v1585_v27 }
 0x3d7   : > { %694 = vadd.xlane.f32.xlu1 %v676_v50 }
 0x3d9   : > { %738 = vadd.xlane.f32.xlu2 %v722_v35  ;;  %690 = vadd.xlane.f32.xlu0 %v674_v31 }
 0x3da   : > { %v639_v32 = vpop.xlane.xlu1 %638 }
 0x3db   : > { %v664_v23 = vadd.f32 %v639_v32, %v607_v3 }
 0x3dc   : > { %v751_v16 = vpop.xlane.xlu2 %750 }
 0x3dd   : > { %v799_v34 = vmul.f32 %v1912_v41, %v664_v23  ;;  %v776_v61 = vadd.f32 %v751_v16, %v703_v59 }
 0x3df   : > { %v815_v1 = vmul.f32 64.0, %v799_v34  ;;  %744 = vadd.xlane.f32.xlu1 %v725_v26 }
 0x3e1   : > { %v831_v6 = vmul.f32 %v815_v1, %v799_v34  ;;  %740 = vadd.xlane.f32.xlu0 %v723_v21 }
 0x3e3   : > { %v847_v3 = vsub.f32 %v776_v61, %v831_v6 }
 0x3e4   : > { %v641_v5 = vpop.xlane.xlu2 %640  ;;  %v753_v28 = vpop.xlane.xlu0 %752 }
 0x3e5   : > { %v870_v42 = vmul.f32 %v1919_v11, %v847_v3  ;;  %v665_v59 = vadd.f32 %v641_v5, %v1872_v13  ;;  %v777_v50 = vadd.f32 %v753_v28, %v705_v25 }
 0x3e7   : > { %1421 = vrsqrt.f32 %v870_v42  ;;  %v1924_v51 = vmul.f32 %v1912_v41, %v665_v59  ;;  %626 = vadd.xlane.f32.xlu1 %v1904_v48  ;;  %vm946_vm3 = vweird.f32 %v870_v42 }
 0x3e9   : > { %v816_v31 = vmul.f32 64.0, %v1924_v51 }
 0x3eb   : > { %v832_v57 = vmul.f32 %v816_v31, %v1924_v51 }
 0x3ec   : > { %v643_v35 = vpop.xlane.xlu2 %642  ;;  %v755_v40 = vpop.xlane.xlu0 %754 }
 0x3ed   : > { %v1422_v32 = vpop.eup %1421  ;;  %v848_v33 = vsub.f32 %v777_v50, %v832_v57  ;;  %v666_v13 = vadd.f32 %v643_v35, %v1857_v10  ;;  %v778_v1 = vadd.f32 %v755_v40, %v1866_v38  ;;  %v1078_v38 = vsub.f32 %v1784_v62, %v799_v34 }
 0x3ee   : > { %v941_v25 = vmul.f32 %v1422_v32, %v870_v42  ;;  %vm947_vm2 = vweird.f32 %v1422_v32  ;;  %v1046_v35 = vsub.f32 %v1633_v44, %v799_v34 }
 0x3ef   : > { %v871_v23 = vmul.f32 %v1919_v11, %v848_v33  ;;  %v1934_v16 = vmul.f32 %v1912_v41, %v666_v13  ;;  %692 = vadd.xlane.f32.xlu1 %v675_v17  ;;  %vm948_vm4 = vmor %vm946_vm3, %vm947_vm2 }
 0x3f0   : > { %v942_v61 = vmul.f32 %v1422_v32, %v941_v25 }
 0x3f1   : > { %1423 = vrsqrt.f32 %v871_v23  ;;  %v817_v26 = vmul.f32 64.0, %v1934_v16  ;;  %vm956_vm6 = vweird.f32 %v871_v23 }
 0x3f2   : > { %v943_v63 = vmul.f32 0.5, %v942_v61 }
 0x3f3   : > { %v833_v27 = vmul.f32 %v817_v26, %v1934_v16 }
 0x3f4   : > { %v645_v21 = vpop.xlane.xlu0 %644  ;;  %v757_v6 = vpop.xlane.xlu1 %756  ;;  %v944_v3 = vsub.f32 1.5, %v943_v63 }
 0x3f5   : > { %v849_v10 = vsub.f32 %v778_v1, %v833_v27  ;;  %v667_v5 = vadd.f32 %v645_v21, %v1851_v52  ;;  %v779_v25 = vadd.f32 %v757_v6, %v1881_v56  ;;  %v1079_v6 = vsub.f32 %v1789_v60, %v1924_v51 }
 0x3f6   : > { %v945_v28 = vmul.f32 %v1422_v32, %v944_v3 }
 0x3f7   : > { %v1424_v59 = vpop.eup %1423  ;;  %v1941_v50 = vmul.f32 %v1919_v11, %v849_v10  ;;  %v1944_v31 = vmul.f32 %v1912_v41, %v667_v5 }
 0x3f8   : > { %v951_v57 = vmul.f32 %v1424_v59, %v871_v23  ;;  %v949_v17 = vsel %vm948_vm4, %v1422_v32, %v945_v28  ;;  %vm957_vm5 = vweird.f32 %v1424_v59  ;;  %v1970_v28 = vld [vmem:[%s2434_s4] ss:$0 sm:$0xff] }
 0x3f9   : > { %1425 = vrsqrt.f32 %v1941_v50  ;;  %v818_v52 = vmul.f32 64.0, %v1944_v31  ;;  %v1950_v42 = vmul.f32 %v1078_v38, %v949_v17  ;;  %v1952_v33 = vmul.f32 %v1046_v35, %v949_v17  ;;  %vm958_vm7 = vmor %vm956_vm6, %vm957_vm5 }
 0x3fa   : > { %v952_v40 = vmul.f32 %v1424_v59, %v951_v57  ;;  %vm966_vm9 = vweird.f32 %v1941_v50 }
 0x3fb   : > { %v834_v13 = vmul.f32 %v818_v52, %v1944_v31 }
 0x3fc   : > { %v647_v61 = vpop.xlane.xlu0 %646  ;;  %v759_v26 = vpop.xlane.xlu1 %758  ;;  %v953_v32 = vmul.f32 0.5, %v952_v40 }
 0x3fd   : > { %v850_v63 = vsub.f32 %v779_v25, %v834_v13  ;;  %v668_v62 = vadd.f32 %v647_v61, %v1837_v43  ;;  %v1047_v43 = vsub.f32 %v1636_v45, %v1924_v51  ;;  %v780_v23 = vadd.f32 %v759_v26, %v1868_v39  ;;  %v1981_v45 = vld [vmem:[%s2433_s3] ss:$0 sm:$0xff] }
 0x3fe   : > { %v954_v44 = vsub.f32 1.5, %v953_v32  ;;  %v1990_v13 = vmul.f32 %v1970_v28, %v1950_v42 }
 0x3ff   : > { %v1426_v34 = vpop.eup %1425  ;;  %v873_v27 = vmul.f32 %v1919_v11, %v850_v63  ;;  %v1959_v1 = vmul.f32 %v1912_v41, %v668_v62 }
 0x400   : > { %v961_v21 = vmul.f32 %v1426_v34, %v1941_v50  ;;  %v955_v3 = vmul.f32 %v1424_v59, %v954_v44  ;;  %vm967_vm8 = vweird.f32 %v1426_v34 }
 0x401   : > { %1427 = vrsqrt.f32 %v873_v27  ;;  %v819_v56 = vmul.f32 64.0, %v1959_v1  ;;  %vm968_vm10 = vmor %vm966_vm9, %vm967_vm8  ;;  %vm976_vm12 = vweird.f32 %v873_v27 }
 0x402   : > { %v962_v10 = vmul.f32 %v1426_v34, %v961_v21  ;;  %v959_v5 = vsel %vm958_vm7, %v1424_v59, %v955_v3  ;;  %v2010_v21 = vmul.f32 %v1981_v45, %v1952_v33 }
 0x403   : > { %v835_v57 = vmul.f32 %v819_v56, %v1959_v1  ;;  %v1974_v17 = vmul.f32 %v1079_v6, %v959_v5  ;;  %v1976_v38 = vmul.f32 %v1047_v43, %v959_v5 }
 0x404   : > { %v649_v35 = vpop.xlane.xlu1 %648  ;;  %v761_v60 = vpop.xlane.xlu2 %760  ;;  %v963_v52 = vmul.f32 0.5, %v962_v10 }
 0x405   : > { %v851_v51 = vsub.f32 %v780_v23, %v835_v57  ;;  %v669_v59 = vadd.f32 %v649_v35, %v1853_v53  ;;  %v1994_v25 = vmul.f32 %v1970_v28, %v1974_v17  ;;  %v1998_v61 = vmul.f32 %v1981_v45, %v1976_v38 }
 0x406   : > { %v964_v63 = vsub.f32 1.5, %v963_v52  ;;  %v781_v10 = vadd.f32 %v761_v60, %v1842_v47 }
 0x407   : > { %v1428_v26 = vpop.eup %1427  ;;  %v2001_v53 = vmul.f32 %v1919_v11, %v851_v51  ;;  %v2004_v32 = vmul.f32 %v1912_v41, %v669_v59 }
 0x408   : > { %v971_v62 = vmul.f32 %v1428_v26, %v873_v27  ;;  %v965_v5 = vmul.f32 %v1426_v34, %v964_v63  ;;  %vm977_vm11 = vweird.f32 %v1428_v26 }
 0x409   : > { %1429 = vrsqrt.f32 %v2001_v53  ;;  %v820_v3 = vmul.f32 64.0, %v2004_v32  ;;  %vm978_vm13 = vmor %vm976_vm12, %vm977_vm11  ;;  %vm986_vm15 = vweird.f32 %v2001_v53 }
 0x40a   : > { %v972_v56 = vmul.f32 %v1428_v26, %v971_v62  ;;  %v969_v60 = vsel %vm968_vm10, %v1426_v34, %v965_v5 }
 0x40b   : > { %v836_v43 = vmul.f32 %v820_v3, %v2004_v32 }
 0x40c   : > { %v651_v57 = vpop.xlane.xlu1 %650  ;;  %v763_v23 = vpop.xlane.xlu2 %762  ;;  %v973_v35 = vmul.f32 0.5, %v972_v56  ;;  %v1081_v56 = vsub.f32 %v1801_v4, %v1944_v31 }
 0x40d   : > { %v852_v52 = vsub.f32 %v781_v10, %v836_v43  ;;  %v670_v51 = vadd.f32 %v651_v57, %v1839_v46  ;;  %v1080_v46 = vsub.f32 %v1794_v0, %v1934_v16  ;;  %v1453_v43 = vld [vmem:[%s1567_s28 + $0x48] sm:$0xff] }
 0x40e   : > { %v974_v59 = vsub.f32 1.5, %v973_v35  ;;  %v1049_v10 = vsub.f32 %v1453_v43, %v1944_v31  ;;  %v1454_v35 = vld [vmem:[%s1567_s28 + $0x40] sm:$0xff] }
 0x40f   : > { %v1430_v62 = vpop.eup %1429  ;;  %v2021_v6 = vmul.f32 %v1919_v11, %v852_v52  ;;  %v2024_v47 = vmul.f32 %v1912_v41, %v670_v51  ;;  %v2035_v5 = vmul.f32 %v1080_v46, %v969_v60  ;;  %v1048_v27 = vsub.f32 %v1454_v35, %v1934_v16 }
 0x410   : > { %v981_v63 = vmul.f32 %v1430_v62, %v2001_v53  ;;  %v975_v3 = vmul.f32 %v1428_v26, %v974_v59  ;;  %v782_v52 = vadd.f32 %v763_v23, %v1830_v29  ;;  %vm987_vm14 = vweird.f32 %v1430_v62 }
 0x411   : > { %1431 = vrsqrt.f32 %v2021_v6  ;;  %v821_v50 = vmul.f32 64.0, %v2024_v47  ;;  %v2045_v40 = vmul.f32 %v1048_v27, %v969_v60  ;;  %vm988_vm0 = vmor %vm986_vm15, %vm987_vm14  ;;  %vm996_vm2 = vweird.f32 %v2021_v6 }
 0x412   : > { %v982_v57 = vmul.f32 %v1430_v62, %v981_v63  ;;  %v979_v34 = vsel %vm978_vm13, %v1428_v26, %v975_v3  ;;  %v2050_v63 = vmul.f32 %v1970_v28, %v2035_v5 }
 0x413   : > { %v837_v0 = vmul.f32 %v821_v50, %v2024_v47  ;;  %v2041_v51 = vmul.f32 %v1081_v56, %v979_v34  ;;  %v2043_v59 = vmul.f32 %v1049_v10, %v979_v34  ;;  %v2071_v50 = vmul.f32 %v1981_v45, %v2045_v40 }
 0x414   : > { %v653_v44 = vpop.xlane.xlu2 %652  ;;  %v765_v4 = vpop.xlane.xlu0 %764  ;;  %v983_v39 = vmul.f32 0.5, %v982_v57 }
 0x415   : > { %v853_v31 = vsub.f32 %v782_v52, %v837_v0  ;;  %v671_v26 = vadd.f32 %v653_v44, %v1817_v15  ;;  %v2054_v16 = vmul.f32 %v1970_v28, %v2041_v51  ;;  %v2058_v29 = vmul.f32 %v1981_v45, %v2043_v59  ;;  %2446 = vst [vmem:[#allocation3_spill] sm:$0xff] %v2071_v50 }
 0x416   : > { %v984_v15 = vsub.f32 1.5, %v983_v39  ;;  %v783_v34 = vadd.f32 %v765_v4, %v1824_v20 }
 0x417   : > { %2445 = vst [vmem:[#allocation2_spill] sm:$0xff] %v2058_v29  ;;  %v1432_v23 = vpop.eup %1431  ;;  %v2061_v3 = vmul.f32 %v1919_v11, %v853_v31  ;;  %v2064_v60 = vmul.f32 %v1912_v41, %v671_v26 }
 0x418   : > { %v991_v44 = vmul.f32 %v1432_v23, %v2021_v6  ;;  %v985_v27 = vmul.f32 %v1430_v62, %v984_v15  ;;  %vm997_vm1 = vweird.f32 %v1432_v23 }
 0x419   : > { %1433 = vrsqrt.f32 %v2061_v3  ;;  %v822_v56 = vmul.f32 64.0, %v2064_v60  ;;  %vm998_vm3 = vmor %vm996_vm2, %vm997_vm1  ;;  %vm1006_vm5 = vweird.f32 %v2061_v3 }
 0x41a   : > { %v992_v43 = vmul.f32 %v1432_v23, %v991_v44  ;;  %v655_v10 = vpop.xlane.xlu1 %654  ;;  %v989_v15 = vsel %vm988_vm0, %v1430_v62, %v985_v27  ;;  %v1456_v62 = vld [vmem:[%s1567_s28 + $0x58] sm:$0xff] }
 0x41b   : > { %v838_v39 = vmul.f32 %v822_v56, %v2064_v60  ;;  %v672_v35 = vadd.f32 %v655_v10, %v1799_v2  ;;  %v1082_v56 = vsub.f32 %v1808_v8, %v1959_v1  ;;  %v1051_v27 = vsub.f32 %v1456_v62, %v2004_v32 }
 0x41c   : > { %v767_v0 = vpop.xlane.xlu0 %766  ;;  %v993_v52 = vmul.f32 0.5, %v992_v43  ;;  %v1455_v43 = vld [vmem:[%s1567_s28 + $0x50] sm:$0xff] }
 0x41d   : > { %v854_v31 = vsub.f32 %v783_v34, %v838_v39  ;;  %v2081_v26 = vmul.f32 %v1912_v41, %v672_v35  ;;  %v1050_v10 = vsub.f32 %v1455_v43, %v1959_v1  ;;  %v1083_v34 = vsub.f32 %v1815_v14, %v2004_v32 }
 0x41e   : > { %v994_v44 = vsub.f32 1.5, %v993_v52  ;;  %v784_v35 = vadd.f32 %v767_v0, %v1813_v12  ;;  %v2102_v52 = vpop.xlane.xlu2 %698  ;;  %v2104_v6 = vmul.f32 %v1082_v56, %v989_v15 }
 0x41f   : > { %v1434_v20 = vpop.eup %1433  ;;  %v2087_v4 = vmul.f32 %v1919_v11, %v854_v31  ;;  %v823_v2 = vmul.f32 64.0, %v2081_v26  ;;  %v2106_v43 = vmul.f32 %v1050_v10, %v989_v15 }
 0x420   : > { %v1001_v39 = vmul.f32 %v1434_v20, %v2061_v3  ;;  %v995_v53 = vmul.f32 %v1432_v23, %v994_v44  ;;  %vm1007_vm4 = vweird.f32 %v1434_v20  ;;  %v1457_v3 = vld [vmem:[%s1567_s28 + $0x60] sm:$0xff] }
 0x421   : > { %1435 = vrsqrt.f32 %v2087_v4  ;;  %v839_v8 = vmul.f32 %v823_v2, %v2081_v26  ;;  %vm1008_vm6 = vmor %vm1006_vm5, %vm1007_vm4  ;;  %vm1016_vm8 = vweird.f32 %v2087_v4 }
 0x422   : > { %v1002_v1 = vmul.f32 %v1434_v20, %v1001_v39  ;;  %v657_v31 = vpop.xlane.xlu1 %656  ;;  %v999_v44 = vsel %vm998_vm3, %v1432_v23, %v995_v53  ;;  %v2137_v53 = vmul.f32 %v1981_v45, %v2106_v43 }
 0x423   : > { %v855_v14 = vsub.f32 %v784_v35, %v839_v8  ;;  %v673_v57 = vadd.f32 %v657_v31, %v1806_v7  ;;  %v2109_v2 = vmul.f32 %v1083_v34, %v999_v44  ;;  %v2111_v12 = vmul.f32 %v1051_v27, %v999_v44 }
 0x424   : > { %v1003_v0 = vmul.f32 0.5, %v1002_v1  ;;  %v2119_v39 = vpop.xlane.xlu0 %700  ;;  %2449 = vst [vmem:[#allocation6_spill] sm:$0xff] %v2137_v53 }
 0x425   : > { %v2114_v46 = vmul.f32 %v1919_v11, %v855_v14  ;;  %v2117_v32 = vmul.f32 %v1912_v41, %v673_v57  ;;  %v2123_v56 = vmul.f32 %v1970_v28, %v2109_v2  ;;  %v2127_v7 = vmul.f32 %v1981_v45, %v2111_v12 }
 0x426   : > { %v1004_v23 = vsub.f32 1.5, %v1003_v0  ;;  %v2133_v57 = vmul.f32 %v1970_v28, %v2104_v6  ;;  %v2146_v14 = vpop.xlane.xlu2 %748 }
 0x427   : > { %2447 = vst [vmem:[#allocation4_spill] sm:$0xff] %v2127_v7  ;;  %v1436_v15 = vpop.eup %1435  ;;  %1437 = vrsqrt.f32 %v2114_v46  ;;  %v824_v10 = vmul.f32 64.0, %v2117_v32  ;;  %vm1026_vm11 = vweird.f32 %v2114_v46 }
 0x428   : > { %2448 = vst [vmem:[#allocation5_spill] sm:$0xff] %v2133_v57  ;;  %v1011_v34 = vmul.f32 %v1436_v15, %v2087_v4  ;;  %v1005_v1 = vmul.f32 %v1434_v20, %v1004_v23  ;;  %vm1017_vm7 = vweird.f32 %v1436_v15 }
 0x429   : > { %v840_v31 = vmul.f32 %v824_v10, %v2117_v32  ;;  %vm1018_vm9 = vmor %vm1016_vm8, %vm1017_vm7 }
 0x42a   : > { %v1012_v62 = vmul.f32 %v1436_v15, %v1011_v34  ;;  %v769_v27 = vpop.xlane.xlu1 %768  ;;  %v1009_v34 = vsel %vm1008_vm6, %v1434_v20, %v1005_v1  ;;  %v1085_v20 = vsub.f32 %v1833_v37, %v2064_v60 }
 0x42b   : > { %v785_v44 = vadd.f32 %v769_v27, %v1826_v24  ;;  %v1084_v24 = vsub.f32 %v1822_v19, %v2024_v47 }
 0x42c   : > { %v1013_v0 = vmul.f32 0.5, %v1012_v62  ;;  %v599_v27 = vpop.xlane.xlu0 %598  ;;  %v1052_v62 = vsub.f32 %v1457_v3, %v2024_v47 }
 0x42d   : > { %v1438_v50 = vpop.eup %1437  ;;  %v856_v29 = vsub.f32 %v785_v44, %v840_v31  ;;  %v2158_v1 = vmul.f32 %v1084_v24, %v1009_v34  ;;  %v1458_v31 = vld [vmem:[%s1567_s28 + $0x68] sm:$0xff] }
 0x42e   : > { %v1021_v8 = vmul.f32 %v1438_v50, %v2114_v46  ;;  %v1014_v35 = vsub.f32 1.5, %v1013_v0  ;;  %vm1027_vm10 = vweird.f32 %v1438_v50  ;;  %v775_v46 = vadd.f32 %v2146_v14, %v2119_v39 }
 0x42f   : > { %v879_v23 = vmul.f32 %v1919_v11, %v856_v29  ;;  %v1053_v29 = vsub.f32 %v1458_v31, %v2064_v60  ;;  %v2171_v3 = vmul.f32 %v1970_v28, %v2158_v1  ;;  %v631_v60 = vpop.xlane.xlu2 %630  ;;  %vm1028_vm12 = vmor %vm1026_vm11, %vm1027_vm10 }
 0x430   : > { %v1022_v10 = vmul.f32 %v1438_v50, %v1021_v8  ;;  %v1015_v53 = vmul.f32 %v1436_v15, %v1014_v35  ;;  %v2162_v8 = vmul.f32 %v1052_v62, %v1009_v34  ;;  %v2187_v34 = vmul.f32 %v1912_v41, %v1893_v9 }
 0x431   : > { %1439 = vrsqrt.f32 %v879_v23  ;;  %2450 = vst [vmem:[#allocation7_spill] sm:$0xff] %v2171_v3  ;;  %v660_v62 = vadd.f32 %v631_v60, %v599_v27  ;;  %vm1036_vm14 = vweird.f32 %v879_v23  ;;  %v1460_v60 = vld [vmem:[%s1567_s28 + $0x78] sm:$0xff] }
 0x432   : > { %v637_v44 = vpop.xlane.xlu1 %636  ;;  %v1019_v19 = vsel %vm1018_vm9, %v1436_v15, %v1015_v53  ;;  %v1023_v4 = vmul.f32 0.5, %v1022_v10  ;;  %v2179_v15 = vmul.f32 %v1981_v45, %v2162_v8  ;;  %v813_v57 = vmul.f32 64.0, %v2187_v34 }
 0x433   : > { %v663_v35 = vadd.f32 %v637_v44, %v1901_v36  ;;  %v2165_v0 = vmul.f32 %v1085_v20, %v1019_v19  ;;  %v2167_v47 = vmul.f32 %v1053_v29, %v1019_v19 }
 0x434   : > { %2452 = vst [vmem:[#allocation9_spill] sm:$0xff] %v2179_v15  ;;  %v1024_v10 = vsub.f32 1.5, %v1023_v4  ;;  %v633_v44 = vpop.xlane.xlu0 %632  ;;  %v829_v31 = vmul.f32 %v813_v57, %v2187_v34  ;;  %v2213_v57 = vmul.f32 %v1912_v41, %v660_v62 }
 0x435   : > { %v2175_v37 = vmul.f32 %v1970_v28, %v2165_v0  ;;  %v2183_v36 = vmul.f32 %v1981_v45, %v2167_v47  ;;  %v2190_v24 = vmul.f32 %v1912_v41, %v663_v35 }
 0x436   : > { %v1025_v9 = vmul.f32 %v1438_v50, %v1024_v10  ;;  %v1086_v10 = vsub.f32 %v1844_v49, %v2081_v26 }
 0x437   : > { %2451 = vst [vmem:[#allocation8_spill] sm:$0xff] %v2175_v37  ;;  %v1440_v53 = vpop.eup %1439  ;;  %v814_v7 = vmul.f32 64.0, %v2190_v24 }
 0x438   : > { %2453 = vst [vmem:[#allocation10_spill] sm:$0xff] %v2183_v36  ;;  %v1031_v20 = vmul.f32 %v1440_v53, %v879_v23  ;;  %vm1037_vm13 = vweird.f32 %v1440_v53  ;;  %v1029_v15 = vsel %vm1028_vm12, %v1438_v50, %v1025_v9  ;;  %v697_v36 = vpop.xlane.xlu2 %696  ;;  %v1055_v50 = vsub.f32 %v1460_v60, %v2117_v32 }
 0x439   : > { %vm1038_vm15 = vmor %vm1036_vm14, %vm1037_vm13  ;;  %v1102_v49 = vmul.f32 %v1086_v10, %v1029_v15 }
 0x43a   : > { %v1032_v29 = vmul.f32 %v1440_v53, %v1031_v20  ;;  %v747_v19 = vpop.xlane.xlu1 %746  ;;  %v830_v20 = vmul.f32 %v814_v7, %v2190_v24  ;;  %v1087_v7 = vsub.f32 %v1859_v30, %v2117_v32 }
 0x43b   : > { %v774_v4 = vadd.f32 %v747_v19, %v2102_v52  ;;  %v2219_v30 = vmul.f32 %v1970_v28, %v1102_v49 }
 0x43c   : > { %v1033_v35 = vmul.f32 0.5, %v1032_v29  ;;  %v1459_v29 = vld [vmem:[%s1567_s28 + $0x70] sm:$0xff]  ;;  %v846_v19 = vsub.f32 %v775_v46, %v830_v20 }
 0x43d   : > { %v1054_v52 = vsub.f32 %v1459_v29, %v2081_v26  ;;  %v845_v27 = vsub.f32 %v774_v4, %v829_v31  ;;  %v743_v29 = vpop.xlane.xlu0 %742 }
 0x43e   : > { %v1034_v3 = vsub.f32 1.5, %v1033_v35 }
 0x43f   : > { %v1070_v26 = vmul.f32 %v1054_v52, %v1029_v15  ;;  %v2216_v39 = vmul.f32 %v1919_v11, %v845_v27  ;;  %v811_v15 = vmul.f32 64.0, %v2213_v57 }
 0x440   : > { %v1035_v37 = vmul.f32 %v1440_v53, %v1034_v3  ;;  %v595_v10 = vpop.xlane.xlu2 %594 }
 0x441   : > { %v2234_v20 = vmul.f32 %v1981_v45, %v1070_v26  ;;  %1441 = vrsqrt.f32 %v2216_v39  ;;  %v827_v27 = vmul.f32 %v811_v15, %v2213_v57  ;;  %vm926_vm1 = vweird.f32 %v2216_v39 }
 0x442   : > { %v601_v23 = vpop.xlane.xlu1 %600  ;;  %v1039_v3 = vsel %vm1038_vm15, %v1440_v53, %v1035_v37  ;;  %v2229_v53 = vmul.f32 %v1919_v11, %v846_v19 }
 0x443   : > { %v1103_v9 = vmul.f32 %v1087_v7, %v1039_v3  ;;  %v1071_v35 = vmul.f32 %v1055_v50, %v1039_v3  ;;  %v661_v37 = vadd.f32 %v633_v44, %v601_v23  ;;  %v1174_v50 = vpack.c.bf16 %v2165_v0, %v2158_v1 }
 0x444   : > { %1443 = vrsqrt.f32 %v2229_v53  ;;  %v1139_v23 = vpack.c.bf16 %v2167_v47, %v2162_v8  ;;  %vm936_vm4 = vweird.f32 %v2229_v53 }
 0x445   : > { %v1175_v14 = vpack.c.bf16 %v1103_v9, %v1102_v49  ;;  %v1140_v31 = vpack.c.bf16 %v1071_v35, %v1070_v26  ;;  %v2222_v32 = vmul.f32 %v1970_v28, %v1103_v9  ;;  %v2225_v62 = vmul.f32 %v1981_v45, %v1071_v35  ;;  %v597_v3 = vpop.xlane.xlu0 %596 }
 0x446   : > { %v2240_v46 = vmul.f32 %v1912_v41, %v661_v37  ;;  %v1138_v37 = vpack.c.bf16 %v2111_v12, %v2106_v43 }
 0x447   : > { %1176 = vmatpush.bf16.xpose.msrb.mxu0 %v1175_v14  ;;  %1225 = vmatpush.bf16.xpose.msrb.mxu1 %v1140_v31  ;;  %v1167_v4 = vpack.c.bf16 %v2222_v32, %v2219_v30  ;;  %v1132_v44 = vpack.c.bf16 %v2225_v62, %v2234_v20  ;;  %v2248_v49 = vpop.eup %1441  ;;  %v1173_v31 = vpack.c.bf16 %v2109_v2, %v2104_v6 }
 0x448   : > { %v812_v9 = vmul.f32 64.0, %v2240_v46  ;;  %v921_v35 = vmul.f32 %v2248_v49, %v2216_v39  ;;  %v629_v0 = vpop.xlane.xlu2 %628  ;;  %vm927_vm0 = vweird.f32 %v2248_v49 }
 0x449   : > { %vm928_vm3 = vmor %vm926_vm1, %vm927_vm0 }
 0x44a   : > { %v695_v52 = vpop.xlane.xlu1 %694  ;;  %v2254_v26 = vpop.eup %1443  ;;  %v828_v1 = vmul.f32 %v812_v9, %v2240_v46  ;;  %v922_v15 = vmul.f32 %v2248_v49, %v921_v35  ;;  %v1172_v9 = vpack.c.bf16 %v2041_v51, %v2035_v5  ;;  %v1137_v35 = vpack.c.bf16 %v2043_v59, %v2045_v40 }
 0x44b   : > { %v772_v7 = vadd.f32 %v743_v29, %v695_v52  ;;  %v931_v47 = vmul.f32 %v2254_v26, %v2229_v53  ;;  %v659_v52 = vadd.f32 %v629_v0, %v597_v3  ;;  %vm937_vm2 = vweird.f32 %v2254_v26 }
 0x44c   : > { %v923_v6 = vmul.f32 0.5, %v922_v15  ;;  %vm938_vm5 = vmor %vm936_vm4, %vm937_vm2  ;;  %v1077_v53 = vsub.f32 %v1855_v55, %v2190_v24 }
 0x44d   : > { %v843_v60 = vsub.f32 %v772_v7, %v827_v27  ;;  %v932_v7 = vmul.f32 %v2254_v26, %v931_v47  ;;  %v2275_v2 = vmul.f32 %v1912_v41, %v659_v52 }
 0x44f   : > { %v2251_v19 = vmul.f32 %v1919_v11, %v843_v60  ;;  %1177 = vmatpush.bf16.xpose.msrb.mxu0 %v1174_v50  ;;  %1226 = vmatpush.bf16.xpose.msrb.mxu1 %v1139_v23  ;;  %v933_v23 = vmul.f32 0.5, %v932_v7 }
 0x451   : > { %1445 = vrsqrt.f32 %v2251_v19  ;;  %vm906_vm10 = vweird.f32 %v2251_v19 }
 0x452   : > { %v745_v29 = vpop.xlane.xlu1 %744 }
 0x453   : > { %v773_v8 = vadd.f32 %v745_v29, %v697_v36  ;;  %v691_v36 = vpop.xlane.xlu0 %690  ;;  %v739_v29 = vpop.xlane.xlu2 %738 }
 0x455   : > { %v844_v14 = vsub.f32 %v773_v8, %v828_v1  ;;  %v924_v1 = vsub.f32 1.5, %v923_v6 }
 0x457   : > { %v2268_v27 = vmul.f32 %v1919_v11, %v844_v14  ;;  %1178 = vmatpush.bf16.xpose.msrb.mxu0 %v1173_v31  ;;  %1227 = vmatpush.bf16.xpose.msrb.mxu1 %v1138_v37  ;;  %v2271_v60 = vpop.eup %1445  ;;  %v934_v14 = vsub.f32 1.5, %v933_v23  ;;  %v770_v31 = vadd.f32 %v739_v29, %v691_v36  ;;  %v925_v59 = vmul.f32 %v2248_v49, %v924_v1 }
 0x458   : > { %v901_v12 = vmul.f32 %v2271_v60, %v2251_v19  ;;  %v2455_v29 = vpack.c.bf16 %v1976_v38, %v1952_v33  ;;  %v1076_v1 = vsub.f32 %v1781_v54, %v2187_v34  ;;  %v1462_v33 = vld [vmem:[%s1567_s28 + $0x28] sm:$0xff]  ;;  %vm907_vm7 = vweird.f32 %v2271_v60 }
 0x459   : > { %1447 = vrsqrt.f32 %v2268_v27  ;;  %v929_v23 = vsel %vm928_vm3, %v2248_v49, %v925_v59  ;;  %v1461_v49 = vld [vmem:[%s1567_s28 + $0x20] sm:$0xff]  ;;  %v1045_v38 = vsub.f32 %v1462_v33, %v2190_v24  ;;  %vm916_vm8 = vweird.f32 %v2268_v27  ;;  %vm908_vm11 = vmor %vm906_vm10, %vm907_vm7 }
 0x45a   : > { %v627_v50 = vpop.xlane.xlu1 %626  ;;  %v902_v47 = vmul.f32 %v2271_v60, %v901_v12  ;;  %v1074_v19 = vsub.f32 %v1875_v22, %v2213_v57 }
 0x45b   : > { %v658_v43 = vadd.f32 %v627_v50, %v595_v10  ;;  %v810_v10 = vmul.f32 64.0, %v2275_v2  ;;  %v741_v37 = vpop.xlane.xlu0 %740  ;;  %v935_v50 = vmul.f32 %v2254_v26, %v934_v14 }
 0x45c   : > { %v903_v36 = vmul.f32 0.5, %v902_v47 }
 0x45d   : > { %v2280_v3 = vmul.f32 %v1912_v41, %v658_v43  ;;  %v826_v52 = vmul.f32 %v810_v10, %v2275_v2 }
 0x45f   : > { %v1448_v8 = vpop.eup %1447  ;;  %v809_v0 = vmul.f32 64.0, %v2280_v3  ;;  %1179 = vmatpush.bf16.xpose.msrb.mxu0 %v1172_v9  ;;  %1228 = vmatpush.bf16.xpose.msrb.mxu1 %v1137_v35  ;;  %v2454_v35 = vpack.c.bf16 %v1974_v17, %v1950_v42  ;;  %v904_v42 = vsub.f32 1.5, %v903_v36  ;;  %v2320_v17 = vmul.f32 %v1076_v1, %v929_v23 }
 0x460   : > { %v911_v41 = vmul.f32 %v1448_v8, %v2268_v27  ;;  %vm917_vm6 = vweird.f32 %v1448_v8  ;;  %v1075_v27 = vsub.f32 %v1884_v58, %v2240_v46  ;;  %v1072_v1 = vsub.f32 %v1904_v48, %v2280_v3 }
 0x461   : > { %v825_v5 = vmul.f32 %v809_v0, %v2280_v3  ;;  %v1044_v0 = vsub.f32 %v1461_v49, %v2187_v34  ;;  %vm918_vm9 = vmor %vm916_vm8, %vm917_vm6  ;;  %v1073_v49 = vsub.f32 %v1896_v18, %v2275_v2 }
 0x462   : > { %v912_v51 = vmul.f32 %v1448_v8, %v911_v41  ;;  %v693_v40 = vpop.xlane.xlu1 %692 }
 0x463   : > { %v841_v15 = vsub.f32 %v770_v31, %v825_v5  ;;  %v771_v7 = vadd.f32 %v741_v37, %v693_v40  ;;  %v2324_v10 = vmul.f32 %v1044_v0, %v929_v23  ;;  %v1465_v0 = vld [vmem:[%s1567_s28] sm:$0xff] }
 0x464   : > { %v913_v6 = vmul.f32 0.5, %v912_v51  ;;  %v1463_v51 = vld [vmem:[%s1567_s28 + $0x18] sm:$0xff] }
 0x465   : > { %v842_v43 = vsub.f32 %v771_v7, %v826_v52  ;;  %v2298_v12 = vmul.f32 %v1919_v11, %v841_v15  ;;  %v1043_v37 = vsub.f32 %v1463_v51, %v2240_v46  ;;  %v1464_v52 = vld [vmem:[%s1567_s28 + $0x10] sm:$0xff] }
 0x466   : > { %v914_v9 = vsub.f32 1.5, %v913_v6  ;;  %v1042_v7 = vsub.f32 %v1464_v52, %v2213_v57 }
 0x467   : > { %v2303_v39 = vmul.f32 %v1919_v11, %v842_v43  ;;  %1180 = vmatpush.bf16.xpose.msrb.mxu0 %v2454_v35  ;;  %1229 = vmatpush.bf16.xpose.msrb.mxu1 %v2455_v29  ;;  %1449 = vrsqrt.f32 %v2298_v12  ;;  %v939_v11 = vsel %vm938_vm5, %v2254_v26, %v935_v50  ;;  %v905_v26 = vmul.f32 %v2271_v60, %v904_v42 }
 0x468   : > { %v915_v54 = vmul.f32 %v1448_v8, %v914_v9  ;;  %v2326_v34 = vmul.f32 %v1077_v53, %v939_v11  ;;  %v2328_v47 = vmul.f32 %v1045_v38, %v939_v11  ;;  %vm886_vm13 = vweird.f32 %v2298_v12 }
 0x469   : > { %1451 = vrsqrt.f32 %v2303_v39  ;;  %v909_v59 = vsel %vm908_vm11, %v2271_v60, %v905_v26  ;;  %vm896_vm0 = vweird.f32 %v2303_v39  ;;  %v1040_v11 = vsub.f32 %v1465_v0, %v2280_v3 }
 0x46a   : > { %v1170_v41 = vpack.c.bf16 %v2326_v34, %v2320_v17  ;;  %v1135_v24 = vpack.c.bf16 %v2328_v47, %v2324_v10  ;;  %v919_v14 = vsel %vm918_vm9, %v1448_v8, %v915_v54  ;;  %v1090_v43 = vmul.f32 %v1074_v19, %v909_v59 }
 0x46b   : > { %v1091_v8 = vmul.f32 %v1075_v27, %v919_v14  ;;  %v1059_v50 = vmul.f32 %v1043_v37, %v919_v14  ;;  %v1058_v58 = vmul.f32 %v1042_v7, %v909_v59  ;;  %v1113_v59 = vmul.f32 %v1981_v45, %v2324_v10 }
 0x46c   : > { %v1114_v19 = vmul.f32 %v1981_v45, %v2328_v47  ;;  %v2456_v7 = vpack.c.bf16 %v1994_v25, %v1990_v13  ;;  %v2458_v10 = vpack.c.bf16 %v2054_v16, %v2050_v63  ;;  %v2462_v47 = vld [vmem:[#allocation5_spill] sm:$0xff]  ;;  %v2467_v25 = vld [vmem:[#allocation8_spill] sm:$0xff] }
 0x46d   : > { %v1450_v55 = vpop.eup %1449  ;;  %v1169_v9 = vpack.c.bf16 %v1091_v8, %v1090_v43  ;;  %v1134_v35 = vpack.c.bf16 %v1059_v50, %v1058_v58  ;;  %v1111_v27 = vmul.f32 %v1981_v45, %v1058_v58  ;;  %v2471_v58 = vld [vmem:[#allocation9_spill] sm:$0xff] }
 0x46e   : > { %v881_v31 = vmul.f32 %v1450_v55, %v2298_v12  ;;  %vm887_vm12 = vweird.f32 %v1450_v55  ;;  %v1466_v12 = vld [vmem:[%s1567_s28 + $0x8] sm:$0xff]  ;;  %v1127_v52 = vpack.c.bf16 %v1114_v19, %v1113_v59 }
 0x46f   : > { %v1452_v5 = vpop.eup %1451  ;;  %1181 = vmatpush.bf16.xpose.msrb.mxu0 %v1170_v41  ;;  %1230 = vmatpush.bf16.xpose.msrb.mxu1 %v1135_v24  ;;  %vm888_vm15 = vmor %vm886_vm13, %vm887_vm12  ;;  %v1041_v53 = vsub.f32 %v1466_v12, %v2275_v2  ;;  %v1147_v2 = vmul.f32 %v1970_v28, %v1091_v8 }
 0x470   : > { %v891_v40 = vmul.f32 %v1452_v5, %v2303_v39  ;;  %v882_v15 = vmul.f32 %v1450_v55, %v881_v31  ;;  %vm897_vm14 = vweird.f32 %v1452_v5  ;;  %v1112_v31 = vmul.f32 %v1981_v45, %v1059_v50 }
 0x471   : > { %vm898_vm1 = vmor %vm896_vm0, %vm897_vm14  ;;  %v2463_v50 = vpack.c.bf16 %v2123_v56, %v2462_v47 }
 0x472   : > { %v892_v36 = vmul.f32 %v1452_v5, %v891_v40  ;;  %v883_v6 = vmul.f32 0.5, %v882_v15  ;;  %v1126_v37 = vpack.c.bf16 %v1112_v31, %v1111_v27  ;;  %v1148_v40 = vmul.f32 %v1970_v28, %v2320_v17 }
 0x473   : > { %v1149_v15 = vmul.f32 %v1970_v28, %v2326_v34  ;;  %v2457_v17 = vpack.c.bf16 %v1998_v61, %v2010_v21  ;;  %v2460_v34 = vld [vmem:[#allocation3_spill] sm:$0xff]  ;;  %v2470_v21 = vld [vmem:[#allocation10_spill] sm:$0xff] }
 0x474   : > { %v884_v23 = vsub.f32 1.5, %v883_v6  ;;  %v893_v46 = vmul.f32 0.5, %v892_v36  ;;  %v2464_v36 = vld [vmem:[#allocation4_spill] sm:$0xff]  ;;  %v2465_v6 = vld [vmem:[#allocation6_spill] sm:$0xff]  ;;  %v2472_v63 = vpack.c.bf16 %v2470_v21, %v2471_v58 }
 0x475   : > { %v1162_v8 = vpack.c.bf16 %v1149_v15, %v1148_v40  ;;  %v2466_v13 = vpack.c.bf16 %v2464_v36, %v2465_v6 }
 0x476   : > { %v885_v60 = vmul.f32 %v1450_v55, %v884_v23  ;;  %v894_v22 = vsub.f32 1.5, %v893_v46 }
 0x477   : > { %1182 = vmatpush.bf16.xpose.msrb.mxu0 %v1169_v9  ;;  %1231 = vmatpush.bf16.xpose.msrb.mxu1 %v1134_v35 }
 0x478   : > { %v889_v57 = vsel %vm888_vm15, %v1450_v55, %v885_v60  ;;  %v895_v29 = vmul.f32 %v1452_v5, %v894_v22 }
 0x479   : > { %v1088_v33 = vmul.f32 %v1072_v1, %v889_v57  ;;  %v1056_v54 = vmul.f32 %v1040_v11, %v889_v57 }
 0x47a   : > { %v899_v42 = vsel %vm898_vm1, %v1452_v5, %v895_v29  ;;  %v1146_v5 = vmul.f32 %v1970_v28, %v1090_v43  ;;  %v2468_v43 = vld [vmem:[#allocation7_spill] sm:$0xff] }
 0x47b   : > { %v1089_v38 = vmul.f32 %v1073_v49, %v899_v42  ;;  %v1057_v26 = vmul.f32 %v1041_v53, %v899_v42  ;;  %v1144_v18 = vmul.f32 %v1970_v28, %v1088_v33  ;;  %v1109_v3 = vmul.f32 %v1981_v45, %v1056_v54 }
 0x47c   : > { %v1161_v51 = vpack.c.bf16 %v1147_v2, %v1146_v5  ;;  %v2469_v61 = vpack.c.bf16 %v2467_v25, %v2468_v43 }
 0x47d   : > { %v1168_v55 = vpack.c.bf16 %v1089_v38, %v1088_v33  ;;  %v1133_v39 = vpack.c.bf16 %v1057_v26, %v1056_v54  ;;  %v1145_v48 = vmul.f32 %v1970_v28, %v1089_v38  ;;  %v1110_v41 = vmul.f32 %v1981_v45, %v1057_v26  ;;  %v2459_v28 = vld [vmem:[#allocation2_spill] sm:$0xff] }
 0x47e   : > { %v2461_v45 = vpack.c.bf16 %v2459_v28, %v2460_v34 }
 0x47f   : > { %1183 = vmatpush.bf16.xpose.msrb.mxu0 %v1168_v55  ;;  %1232 = vmatpush.bf16.xpose.msrb.mxu1 %v1133_v39  ;;  %v1160_v24 = vpack.c.bf16 %v1145_v48, %v1144_v18  ;;  %v1125_v14 = vpack.c.bf16 %v1110_v41, %v1109_v3 }
 0x486   : > { %1184 = vmatmul.bf16.vlgmr.msrb.gmra.mxu0 %v1160_v24  ;;  %1233 = vmatmul.bf16.vlgmr.msrb.gmra.mxu1 %v1125_v14 }
 0x496   : > { %1189 = vmatmul.bf16.gmra.mxu0 %v1161_v51  ;;  %1238 = vmatmul.bf16.gmra.mxu1 %v1126_v37 }
 0x4a6   : > { %1194 = vmatmul.bf16.gmra.mxu0 %v1162_v8  ;;  %1243 = vmatmul.bf16.gmra.mxu1 %v1127_v52 }
 0x4b6   : > { %1199 = vmatmul.bf16.gmra.mxu0 %v2456_v7  ;;  %1248 = vmatmul.bf16.gmra.mxu1 %v2457_v17 }
 0x4c6   : > { %1204 = vmatmul.bf16.gmra.mxu0 %v2458_v10  ;;  %1253 = vmatmul.bf16.gmra.mxu1 %v2461_v45 }
 0x4d6   : > { %1209 = vmatmul.bf16.gmra.mxu0 %v2463_v50  ;;  %1258 = vmatmul.bf16.gmra.mxu1 %v2466_v13 }
 0x4e6   : > { %1214 = vmatmul.bf16.gmra.mxu0 %v2469_v61  ;;  %1263 = vmatmul.bf16.gmra.mxu1 %v2472_v63 }
 0x4f6   : > { %1219 = vmatmul.bf16.gmra.mxu0 %v1167_v4  ;;  %1268 = vmatmul.bf16.gmra.mxu1 %v1132_v44 }
 0x503   : > { %v1185_v16 = vpop.f32.mrf.mxu0  ;;  %v1234_v56 = vpop.f32.mrf.mxu1 }
 0x504   : > { %v1235_v23 = vadd.f32 %v1234_v56, %v1185_v16 }
 0x506   : > { %1274 = vst [vmem:[%s2409_s29] sm:$0xff] %v1235_v23 }
 0x50b   : > { %v1187_v30 = vpop.f32.mrf.mxu0  ;;  %v1236_v32 = vpop.f32.mrf.mxu1 }
 0x50c   : > { %v1237_v4 = vadd.f32 %v1236_v32, %v1187_v30 }
 0x50e   : > { %1275 = vst [vmem:[%s2409_s29 + $0x8] sm:$0xff] %v1237_v4 }
 0x513   : > { %v1190_v62 = vpop.f32.mrf.mxu0  ;;  %v1239_v20 = vpop.f32.mrf.mxu1 }
 0x514   : > { %v1240_v44 = vadd.f32 %v1239_v20, %v1190_v62 }
 0x516   : > { %1276 = vst [vmem:[%s2409_s29 + $0x10] sm:$0xff] %v1240_v44 }
 0x51b   : > { %v1192_v46 = vpop.f32.mrf.mxu0  ;;  %v1241_v9 = vpop.f32.mrf.mxu1 }
 0x51c   : > { %v1242_v35 = vadd.f32 %v1241_v9, %v1192_v46 }
 0x51e   : > { %1277 = vst [vmem:[%s2409_s29 + $0x18] sm:$0xff] %v1242_v35 }
 0x523   : > { %v1195_v60 = vpop.f32.mrf.mxu0  ;;  %v1244_v22 = vpop.f32.mrf.mxu1 }
 0x524   : > { %v1245_v57 = vadd.f32 %v1244_v22, %v1195_v60 }
 0x526   : > { %1278 = vst [vmem:[%s2409_s29 + $0x20] sm:$0xff] %v1245_v57 }
 0x52b   : > { %v1197_v29 = vpop.f32.mrf.mxu0  ;;  %v1246_v1 = vpop.f32.mrf.mxu1 }
 0x52c   : > { %v1247_v49 = vadd.f32 %v1246_v1, %v1197_v29 }
 0x52e   : > { %1279 = vst [vmem:[%s2409_s29 + $0x28] sm:$0xff] %v1247_v49 }
 0x533   : > { %v1200_v0 = vpop.f32.mrf.mxu0  ;;  %v1249_v11 = vpop.f32.mrf.mxu1 }
 0x534   : > { %v1250_v12 = vadd.f32 %v1249_v11, %v1200_v0 }
 0x536   : > { %1280 = vst [vmem:[%s2409_s29 + $0x30] sm:$0xff] %v1250_v12 }
 0x53b   : > { %v1202_v53 = vpop.f32.mrf.mxu0  ;;  %v1251_v42 = vpop.f32.mrf.mxu1 }
 0x53c   : > { %v1252_v33 = vadd.f32 %v1251_v42, %v1202_v53 }
 0x53e   : > { %1281 = vst [vmem:[%s2409_s29 + $0x38] sm:$0xff] %v1252_v33 }
 0x543   : > { %v1205_v38 = vpop.f32.mrf.mxu0  ;;  %v1254_v54 = vpop.f32.mrf.mxu1 }
 0x544   : > { %v1255_v26 = vadd.f32 %v1254_v54, %v1205_v38 }
 0x546   : > { %1282 = vst [vmem:[%s2409_s29 + $0x40] sm:$0xff] %v1255_v26 }
 0x54b   : > { %v1207_v55 = vpop.f32.mrf.mxu0  ;;  %v1256_v39 = vpop.f32.mrf.mxu1 }
 0x54c   : > { %v1257_v48 = vadd.f32 %v1256_v39, %v1207_v55 }
 0x54e   : > { %1283 = vst [vmem:[%s2409_s29 + $0x48] sm:$0xff] %v1257_v48 }
 0x553   : > { %v1210_v41 = vpop.f32.mrf.mxu0  ;;  %v1259_v18 = vpop.f32.mrf.mxu1 }
 0x554   : > { %v1260_v3 = vadd.f32 %v1259_v18, %v1210_v41 }
 0x556   : > { %1284 = vst [vmem:[%s2409_s29 + $0x50] sm:$0xff] %v1260_v3 }
 0x55b   : > { %v1212_v24 = vpop.f32.mrf.mxu0  ;;  %v1261_v14 = vpop.f32.mrf.mxu1 }
 0x55c   : > { %v1262_v2 = vadd.f32 %v1261_v14, %v1212_v24 }
 0x55e   : > { %1285 = vst [vmem:[%s2409_s29 + $0x58] sm:$0xff] %v1262_v2 }
 0x563   : > { %v1215_v31 = vpop.f32.mrf.mxu0  ;;  %v1264_v5 = vpop.f32.mrf.mxu1 }
 0x564   : > { %v1265_v27 = vadd.f32 %v1264_v5, %v1215_v31 }
 0x566   : > { %1286 = vst [vmem:[%s2409_s29 + $0x60] sm:$0xff] %v1265_v27 }
 0x56b   : > { %v1217_v51 = vpop.f32.mrf.mxu0  ;;  %v1266_v37 = vpop.f32.mrf.mxu1 }
 0x56c   : > { %v1267_v40 = vadd.f32 %v1266_v37, %v1217_v51 }
 0x56e   : > { %1287 = vst [vmem:[%s2409_s29 + $0x68] sm:$0xff] %v1267_v40 }
 0x573   : > { %v1220_v59 = vpop.f32.mrf.mxu0  ;;  %v1269_v15 = vpop.f32.mrf.mxu1 }
 0x574   : > { %v1270_v19 = vadd.f32 %v1269_v15, %v1220_v59 }
 0x576   : > { %1288 = vst [vmem:[%s2409_s29 + $0x70] sm:$0xff] %v1270_v19 }
 0x57b   : > { %v1222_v8 = vpop.f32.mrf.mxu0  ;;  %v1271_v52 = vpop.f32.mrf.mxu1 }
 0x57c   : > { %v1272_v7 = vadd.f32 %v1271_v52, %v1222_v8 }
 0x57e   : > { %1289 = vst [vmem:[%s2409_s29 + $0x78] sm:$0xff] %v1272_v7 }
 0x57f PF: > { %s15_s18 = sadd.s32 1, %s1473_s18  }
 0x580   : > { %p12_p4 = scmp.ge.s32.totalorder %s15_s18, 4  }
 0x582   :  { %14 = sbr.rel (!%p12_p4) target bundleno = 1 (0x1), region = 74 }

</bundles_post_ra>
